<compile_context>
chip_gen: v5e
topology: v5e:2x2
jax: 0.10.0
libtpu: 0.0.40
codegen_flags: <defaults>
</compile_context>

<pallas_src>
import functools

import jax
import jax.numpy as jnp
from jax.experimental import pallas as pl
from jax.experimental.pallas import tpu as pltpu


# ----------------------------------------------------------------------------
# Small planning helpers (all static / trace-time; no device work)
# ----------------------------------------------------------------------------
def _round_up(x, m):
    return ((x + m - 1) // m) * m


def _vmem_budget_bytes():
    """Generation-aware scoped-VMEM limit: physical capacity minus headroom."""
    cap = 64 * 1024 * 1024  # safe fallback (v7x physical per-TC VMEM)
    try:
        cap = int(pltpu.get_tpu_info().vmem_capacity_bytes)
    except Exception:
        pass
    # Leave 16 MiB for Mosaic internal scratch / pipeline overhead.
    return max(32 * 1024 * 1024, min(cap, 128 * 1024 * 1024) - 16 * 1024 * 1024)


def _choose_tm(M, tm):
    """Row tile size. Prefer a multiple-of-8 divisor of M (no padding copy)
    that leaves >= 2 row tiles (megacore / 2-TC load balance); else pad."""
    t = (min(tm, M) // 8) * 8
    best = None
    for cand in range(t, 7, -8):
        if M % cand == 0:
            if M // cand >= 2:
                return cand, M
            if best is None:
                best = cand
    if best is not None:
        return best, M
    # TODO(synk): ragged tails fall back to a padded copy of x; a masked tail
    # tile would avoid the extra M*d1 HBM round trip.
    tm_eff = max(8, (min(tm, _round_up(M, 8)) // 8) * 8)
    return tm_eff, _round_up(M, tm_eff)


def _valid_d2_chunks(d2):
    """Candidate d2-chunk widths: full d2, plus 128-multiple divisors of d2."""
    cands = {d2}
    for c in range(128, d2, 128):
        if d2 % c == 0:
            cands.add(c)
    return sorted(cands, reverse=True)


def _estimate_vmem(tm, tn, d1, d2, w_item, x_item, o_item):
    """Rough VMEM working set for one grid step (double-buffered operands)."""
    wgt = 6 * d1 * tn * w_item                  # [W1|W2](d1,2tn) + W3(tn,d1), x2 bufs
    bia = 2 * (2 * tn + d1) * 4                 # f32 biases, x2 bufs
    xio = 2 * tm * d1 * (x_item + o_item)       # x tile + out tile, x2 bufs
    acc = 0 if tn == d2 else tm * d1 * 4        # f32 accumulator (chunked only)
    tmp = tm * (2 * tn) * 4 + tm * tn * w_item + tm * d1 * 4   # o12 / gated / partial
    return wgt + bia + xio + acc + tmp


def plan_glu(M, d1, d2, *, tm=512, tn=None, compute_dtype=jnp.bfloat16,
             x_dtype=jnp.float32, out_dtype=None, vmem_limit=None):
    """Pick the d2-chunk width and VMEM limit once, at load time (outside jit).

    Returns (tn_eff, vmem_limit). tn_eff == d2 (weights fully VMEM-resident)
    whenever the working set fits; otherwise the largest 128-multiple divisor
    of d2 that does.
    """
    out_dtype = out_dtype if out_dtype is not None else x_dtype
    if vmem_limit is None:
        vmem_limit = _vmem_budget_bytes()
    w_item = jnp.dtype(compute_dtype).itemsize
    x_item = jnp.dtype(x_dtype).itemsize
    o_item = jnp.dtype(out_dtype).itemsize
    tm_eff, _ = _choose_tm(M, tm)

    cands = _valid_d2_chunks(d2)
    if tn is not None:
        limited = [c for c in cands if c <= tn]
        cands = limited if limited else [cands[-1]]
    tn_eff = cands[-1]
    for c in cands:
        if _estimate_vmem(tm_eff, c, d1, d2, w_item, x_item, o_item) <= vmem_limit:
            tn_eff = c
            break
    return tn_eff, vmem_limit


# ----------------------------------------------------------------------------
# Parameter packing (done once, outside jit)
# ----------------------------------------------------------------------------
def pack_glu_params(w1, b1, w2, b2, w3, b3, *, d2_chunk, compute_dtype=jnp.bfloat16):
    """Cast weights to the compute dtype and chunk-interleave [W1|W2] so one
    BlockSpec block of shape (d1, 2*tn) carries both operands of the fused
    matmul for d2-chunk j. Biases stay f32 (accumulation precision)."""
    d1, d2 = w1.shape
    tn = d2_chunk
    assert d2 % tn == 0, "d2_chunk must divide d2"
    n = d2 // tn
    wd = compute_dtype if compute_dtype is not None else w1.dtype

    w1c = w1.astype(wd).reshape(d1, n, tn)
    w2c = w2.astype(wd).reshape(d1, n, tn)
    w12 = jnp.concatenate([w1c, w2c], axis=2).reshape(d1, 2 * d2)

    b1c = b1.astype(jnp.float32).reshape(1, n, tn)
    b2c = b2.astype(jnp.float32).reshape(1, n, tn)
    b12 = jnp.concatenate([b1c, b2c], axis=2).reshape(1, 2 * d2)

    return w12, b12, w3.astype(wd), b3.astype(jnp.float32)


# ----------------------------------------------------------------------------
# Kernels
# ----------------------------------------------------------------------------
def _glu_kernel_fused(x_ref, w12_ref, b12_ref, w3_ref, b3_ref, o_ref):
    """Single d2 chunk: whole GLU for one (tm, d1) row tile. Weight index maps
    are constant across the row grid, so weights are fetched from HBM once and
    stay VMEM-resident. No accumulator scratch, output written directly."""
    x = x_ref[...].astype(w12_ref.dtype)                       # in-kernel cast
    o12 = jnp.dot(x, w12_ref[...], preferred_element_type=jnp.float32) + b12_ref[...]
    h = o12.shape[1] // 2                                       # lane-aligned split
    gated = (o12[:, :h] * o12[:, h:]).astype(w3_ref.dtype)      # identity act_fun
    out = jnp.dot(gated, w3_ref[...], preferred_element_type=jnp.float32) + b3_ref[...]
    o_ref[...] = out.astype(o_ref.dtype)                        # identity fina_act


def _glu_kernel_fused_chunked(x_ref, w12_ref, b12_ref, w3_ref, b3_ref, o_ref, acc_ref):
    """d2 chunked: accumulate gated_j @ W3[j] into an f32 scratch. The scratch
    is initialized with (first partial + b3) — no zero store / epilogue add."""
    j = pl.program_id(1)

    x = x_ref[...].astype(w12_ref.dtype)
    o12 = jnp.dot(x, w12_ref[...], preferred_element_type=jnp.float32) + b12_ref[...]
    h = o12.shape[1] // 2
    gated = (o12[:, :h] * o12[:, h:]).astype(w3_ref.dtype)
    partial = jnp.dot(gated, w3_ref[...], preferred_element_type=jnp.float32)

    @pl.when(j == 0)
    def _():
        acc_ref[...] = partial + b3_ref[...]

    @pl.when(j > 0)
    def _():
        acc_ref[...] += partial

    @pl.when(j == pl.num_programs(1) - 1)
    def _():
        o_ref[...] = acc_ref[...].astype(o_ref.dtype)


# ----------------------------------------------------------------------------
# Forward wrapper
# ----------------------------------------------------------------------------
@functools.partial(jax.jit, static_argnames=("d2", "tn", "tm", "vmem_limit"))
def glu_forward(x, w12, b12, w3, b3, *, d2, tn, tm=512, vmem_limit=None):
    """x: (B, S, d1) -> (B, S, d1). Packed params from pack_glu_params."""
    B, S, d1 = x.shape
    M = B * S
    out_dtype = x.dtype
    assert d2 % tn == 0
    n_chunks = d2 // tn

    if vmem_limit is None:
        vmem_limit = _vmem_budget_bytes()

    x2d = x.reshape(M, d1)
    tm_eff, M_pad = _choose_tm(M, tm)
    if M_pad != M:
        x2d = jnp.pad(x2d, ((0, M_pad - M), (0, 0)))
    n_row = M_pad // tm_eff

    # Accurate traffic estimate: weights are read once when resident (n_chunks
    # == 1, constant index maps), otherwise once per row tile.
    w_item = jnp.dtype(w12.dtype).itemsize
    x_item = jnp.dtype(x2d.dtype).itemsize
    o_item = jnp.dtype(out_dtype).itemsize
    w_reads = 1 if n_chunks == 1 else n_row
    cost = pl.CostEstimate(
        flops=6 * M_pad * d1 * d2,
        transcendentals=0,
        bytes_accessed=(M_pad * d1 * (x_item + o_item)
                        + w_reads * 3 * d1 * d2 * w_item
                        + (2 * d2 + d1) * 4),
    )

    if n_chunks == 1:
        out2d = pl.pallas_call(
            _glu_kernel_fused,
            out_shape=jax.ShapeDtypeStruct((M_pad, d1), out_dtype),
            grid_spec=pltpu.PrefetchScalarGridSpec(
                num_scalar_prefetch=0,
                grid=(n_row,),
                in_specs=[
                    pl.BlockSpec((tm_eff, d1), lambda i: (i, 0)),      # x row tile
                    pl.BlockSpec((d1, 2 * d2), lambda i: (0, 0)),      # [W1|W2] (resident)
                    pl.BlockSpec((1, 2 * d2), lambda i: (0, 0)),       # [b1|b2]
                    pl.BlockSpec((d2, d1), lambda i: (0, 0)),          # W3 (resident)
                    pl.BlockSpec((1, d1), lambda i: (0, 0)),           # b3
                ],
                out_specs=pl.BlockSpec((tm_eff, d1), lambda i: (i, 0)),
            ),
            compiler_params=pltpu.CompilerParams(
                dimension_semantics=("parallel",),
                vmem_limit_bytes=vmem_limit),
            cost_estimate=cost,
        )(x2d, w12, b12, w3, b3)
    else:
        out2d = pl.pallas_call(
            _glu_kernel_fused_chunked,
            out_shape=jax.ShapeDtypeStruct((M_pad, d1), out_dtype),
            grid_spec=pltpu.PrefetchScalarGridSpec(
                num_scalar_prefetch=0,
                grid=(n_row, n_chunks),
                in_specs=[
                    pl.BlockSpec((tm_eff, d1), lambda i, j: (i, 0)),   # x row tile
                    pl.BlockSpec((d1, 2 * tn), lambda i, j: (0, j)),   # [W1|W2] chunk j
                    pl.BlockSpec((1, 2 * tn), lambda i, j: (0, j)),    # [b1|b2] chunk j
                    pl.BlockSpec((tn, d1), lambda i, j: (j, 0)),       # W3 chunk j
                    pl.BlockSpec((1, d1), lambda i, j: (0, 0)),        # b3 (constant)
                ],
                out_specs=pl.BlockSpec((tm_eff, d1), lambda i, j: (i, 0)),
                scratch_shapes=[pltpu.VMEM((tm_eff, d1), jnp.float32)],
            ),
            compiler_params=pltpu.CompilerParams(
                dimension_semantics=("parallel", "arbitrary"),
                vmem_limit_bytes=vmem_limit),
            cost_estimate=cost,
        )(x2d, w12, b12, w3, b3)

    if M_pad != M:
        out2d = out2d[:M]
    return out2d.reshape(B, S, d1)


# ----------------------------------------------------------------------------
# Synthetic init + pure-JAX reference
# ----------------------------------------------------------------------------
def init_glu_params(key, d1, glu_expand_ratio=2, dtype=jnp.float32):
    """Deterministic synthetic init matching nn.Linear shapes.
    PyTorch stores Linear weight as (out, in); here we keep (in, out)."""
    d2 = int(d1 * glu_expand_ratio)
    k1, k2, k3, k4, k5, k6 = jax.random.split(key, 6)
    s1 = 1.0 / jnp.sqrt(d1)
    s3 = 1.0 / jnp.sqrt(d2)
    w1 = jax.random.uniform(k1, (d1, d2), dtype, -s1, s1)
    b1 = jax.random.uniform(k2, (1, d2), dtype, -s1, s1)
    w2 = jax.random.uniform(k3, (d1, d2), dtype, -s1, s1)
    b2 = jax.random.uniform(k4, (1, d2), dtype, -s1, s1)
    w3 = jax.random.uniform(k5, (d2, d1), dtype, -s3, s3)
    b3 = jax.random.uniform(k6, (1, d1), dtype, -s3, s3)
    return w1, b1, w2, b2, w3, b3


def glu_reference(x, w1, b1, w2, b2, w3, b3):
    """Pure-JAX reference mirroring the PyTorch forward (identity activations)."""
    o1 = x @ w1 + b1
    o2 = x @ w2 + b2
    return (o1 * o2) @ w3 + b3


if __name__ == "__main__":
    key = jax.random.PRNGKey(0)
    kx, kp = jax.random.split(key)

    # Small but TPU-friendly shapes: d1 multiple of 128 keeps stores lane-dense;
    # M = 400 exercises the divisor-based tm selection (200 x 2, no padding),
    # d2 = 256 lets us exercise both the resident and the chunked paths.
    B, S, d1 = 2, 200, 128
    x = jax.random.normal(kx, (B, S, d1), dtype=jnp.float32)
    w1, b1, w2, b2, w3, b3 = init_glu_params(kp, d1, glu_expand_ratio=2)   # d2 = 256
    d2 = w1.shape[1]
    M = B * S

    ref = glu_reference(x.reshape(M, d1), w1, b1, w2, b2, w3, b3).reshape(B, S, d1)

    # --- f32 path, auto plan (weights fully VMEM-resident, fused single chunk) ---
    tn32, vmem_limit = plan_glu(M, d1, d2, compute_dtype=jnp.float32, x_dtype=x.dtype)
    p32 = pack_glu_params(w1, b1, w2, b2, w3, b3, d2_chunk=tn32, compute_dtype=jnp.float32)
    out32 = jax.block_until_ready(glu_forward(x, *p32, d2=d2, tn=tn32, vmem_limit=vmem_limit))
    assert out32.shape == (B, S, d1)
    assert jnp.allclose(out32, ref, atol=1e-4, rtol=1e-4), "f32 resident path mismatch"

    # --- f32 path, forced tn=128: exercises the chunked-accumulator kernel ---
    p32c = pack_glu_params(w1, b1, w2, b2, w3, b3, d2_chunk=128, compute_dtype=jnp.float32)
    out32c = jax.block_until_ready(glu_forward(x, *p32c, d2=d2, tn=128, vmem_limit=vmem_limit))
    assert jnp.allclose(out32c, ref, atol=1e-4, rtol=1e-4), "f32 chunked path mismatch"

    # --- bf16 default (MXU-friendly), f32 accumulation/biases — looser tolerance ---
    tnbf, vmem_limit = plan_glu(M, d1, d2, x_dtype=x.dtype)          # bf16 default
    pbf = pack_glu_params(w1, b1, w2, b2, w3, b3, d2_chunk=tnbf)     # bf16 default
    outbf = jax.block_until_ready(glu_forward(x, *pbf, d2=d2, tn=tnbf, vmem_limit=vmem_limit))
    rel_err = jnp.max(jnp.abs(outbf - ref)) / (jnp.max(jnp.abs(ref)) + 1e-6)
    assert rel_err < 3e-2, f"bf16 mismatch vs reference: rel err {rel_err}"

    # TODO(synk): non-default act_fun / fina_act and dropout p>0 are not
    # implemented — module defaults are identity activations and p=0.0.
    print("KERNEL_OK")
</pallas_src>

<mosaic_0001>
module attributes {stable_mosaic.version = 11 : i64} {
  func.func @_glu_kernel_fused(%arg0: i32, %arg1: memref<200x128xf32, #tpu.memory_space<vmem>>, %arg2: memref<128x512xf32, #tpu.memory_space<vmem>>, %arg3: memref<1x512xf32, #tpu.memory_space<vmem>>, %arg4: memref<256x128xf32, #tpu.memory_space<vmem>>, %arg5: memref<1x128xf32, #tpu.memory_space<vmem>>, %arg6: memref<200x128xf32, #tpu.memory_space<vmem>>) attributes {dimension_semantics = [#tpu.dimension_semantics<parallel>], iteration_bounds = array<i64: 2>, scalar_prefetch = 0 : i64, scratch_operands = 0 : i64, tpu.core_type = #tpu.core_type<tc>, window_params = [{transform_indices = @transform_0, window_bounds = array<i64: 200, 128>}, {pipeline_mode = #tpu.pipeline_mode<synchronous>, transform_indices = @transform_1, window_bounds = array<i64: 128, 512>}, {pipeline_mode = #tpu.pipeline_mode<synchronous>, transform_indices = @transform_2, window_bounds = array<i64: 1, 512>}, {pipeline_mode = #tpu.pipeline_mode<synchronous>, transform_indices = @transform_3, window_bounds = array<i64: 256, 128>}, {pipeline_mode = #tpu.pipeline_mode<synchronous>, transform_indices = @transform_4, window_bounds = array<i64: 1, 128>}, {transform_indices = @transform_5, window_bounds = array<i64: 200, 128>}]} {
    %c0 = arith.constant 0 : index
    %c0_0 = arith.constant 0 : index
    %0 = vector.load %arg1[%c0, %c0_0] : memref<200x128xf32, #tpu.memory_space<vmem>>, vector<200x128xf32>
    %c0_1 = arith.constant 0 : index
    %c0_2 = arith.constant 0 : index
    %1 = vector.load %arg2[%c0_1, %c0_2] : memref<128x512xf32, #tpu.memory_space<vmem>>, vector<128x512xf32>
    %cst = arith.constant dense<0.000000e+00> : vector<200x512xf32>
    %2 = tpu.matmul %0, %1, %cst {dimension_numbers = #tpu.dot_dimension_numbers<[1], [0], [0], [1], [0, 0, 1, 1], [], []>} : vector<200x128xf32>, vector<128x512xf32>, vector<200x512xf32> -> vector<200x512xf32>
    %c0_3 = arith.constant 0 : index
    %c0_4 = arith.constant 0 : index
    %3 = vector.load %arg3[%c0_3, %c0_4] : memref<1x512xf32, #tpu.memory_space<vmem>>, vector<1x512xf32>
    %4 = vector.broadcast %3 : vector<1x512xf32> to vector<200x512xf32>
    %5 = arith.addf %2, %4 : vector<200x512xf32>
    %6 = vector.extract_strided_slice %5 {offsets = [0, 0], sizes = [200, 256], strides = [1, 1]} : vector<200x512xf32> to vector<200x256xf32>
    %7 = vector.extract_strided_slice %5 {offsets = [0, 256], sizes = [200, 256], strides = [1, 1]} : vector<200x512xf32> to vector<200x256xf32>
    %8 = arith.mulf %6, %7 : vector<200x256xf32>
    %c0_5 = arith.constant 0 : index
    %c0_6 = arith.constant 0 : index
    %9 = vector.load %arg4[%c0_5, %c0_6] : memref<256x128xf32, #tpu.memory_space<vmem>>, vector<256x128xf32>
    %cst_7 = arith.constant dense<0.000000e+00> : vector<200x128xf32>
    %10 = tpu.matmul %8, %9, %cst_7 {dimension_numbers = #tpu.dot_dimension_numbers<[1], [0], [0], [1], [0, 0, 1, 1], [], []>} : vector<200x256xf32>, vector<256x128xf32>, vector<200x128xf32> -> vector<200x128xf32>
    %c0_8 = arith.constant 0 : index
    %c0_9 = arith.constant 0 : index
    %11 = vector.load %arg5[%c0_8, %c0_9] : memref<1x128xf32, #tpu.memory_space<vmem>>, vector<1x128xf32>
    %12 = vector.broadcast %11 : vector<1x128xf32> to vector<200x128xf32>
    %13 = arith.addf %10, %12 : vector<200x128xf32>
    %c0_10 = arith.constant 0 : index
    %c0_11 = arith.constant 0 : index
    %14 = vector.load %arg6[%c0_10, %c0_11] : memref<200x128xf32, #tpu.memory_space<vmem>>, vector<200x128xf32>
    tpu.vector_store %arg6[%c0_10, %c0_11], %13 {strides = array<i32>} : memref<200x128xf32, #tpu.memory_space<vmem>>, vector<200x128xf32>,
    return
  }
  func.func @transform_0(%arg0: i32) -> (i32, i32) {
    %c0_i32 = arith.constant 0 : i32
    %c0_i32_0 = arith.constant 0 : i32
    return %arg0, %c0_i32 : i32, i32
  }
  func.func @transform_1(%arg0: i32) -> (i32, i32) {
    %c0_i32 = arith.constant 0 : i32
    %c0_i32_0 = arith.constant 0 : i32
    %c0_i32_1 = arith.constant 0 : i32
    return %c0_i32, %c0_i32_0 : i32, i32
  }
  func.func @transform_2(%arg0: i32) -> (i32, i32) {
    %c0_i32 = arith.constant 0 : i32
    %c0_i32_0 = arith.constant 0 : i32
    %c0_i32_1 = arith.constant 0 : i32
    return %c0_i32, %c0_i32_0 : i32, i32
  }
  func.func @transform_3(%arg0: i32) -> (i32, i32) {
    %c0_i32 = arith.constant 0 : i32
    %c0_i32_0 = arith.constant 0 : i32
    %c0_i32_1 = arith.constant 0 : i32
    return %c0_i32, %c0_i32_0 : i32, i32
  }
  func.func @transform_4(%arg0: i32) -> (i32, i32) {
    %c0_i32 = arith.constant 0 : i32
    %c0_i32_0 = arith.constant 0 : i32
    %c0_i32_1 = arith.constant 0 : i32
    return %c0_i32, %c0_i32_0 : i32, i32
  }
  func.func @transform_5(%arg0: i32) -> (i32, i32) {
    %c0_i32 = arith.constant 0 : i32
    %c0_i32_0 = arith.constant 0 : i32
    return %arg0, %c0_i32 : i32, i32
  }
}

</mosaic_0001>

<bundles_post_ra>
// kernel: glu_forward.1
= control target key start
LH: loop header
LB: loop body
LE: loop exit
PB: predicated region body
PF: predicated region fallthrough
CT: control target
= control target key end

     0   :  { %s2049_s0 = inlined_call_operand.hbm [shape: f32[400,128], index: 0, kind: input, shape index: {}]   ;;  %s2050_s1 = inlined_call_operand.hbm [shape: f32[128,512], index: 1, kind: input, shape index: {}]   ;;  %s2051_s2 = inlined_call_operand.hbm [shape: f32[1,512], index: 2, kind: input, shape index: {}]   ;;  %s2052_s3 = inlined_call_operand.hbm [shape: f32[256,128], index: 3, kind: input, shape index: {}]   ;;  %s2053_s4 = inlined_call_operand.vmem [shape: f32[1,128], index: 4, kind: input, shape index: {}]   ;;  %s2054_s5 = inlined_call_operand.hbm [shape: f32[400,128], index: 5, kind: output, shape index: {}]  }
   0x1   :  { %2057 = sst [smem:[#allocation15_spill]] %s2050_s1 }
   0x2   :  { %10 = vsyncpa [#allocation3], 0 }
   0x3   :  { %12 = vsyncpa [#allocation3 + $0x1], 0 }
   0x4   :  { %13 = vsyncpa [#allocation6], 0 }
   0x5   :  { %14 = vsyncpa [#allocation9], 0 }
   0x6   :  { %15 = vsyncpa [#allocation4], 0 }
   0x7   :  { %17 = vsyncpa [#allocation4 + $0x1], 0  ;;  %s1544_s18 = smov 0   ;;  %s1546_s19 = smov 0  }
   0x8   :  { %s1548_s20 = smov 0   ;;  %s1550_s21 = smov 0  }
   0x9 LB: > { %s1565_s22 = sadd.s32 4294967295, %s1503_s21   ;;  %s1175_s23 = sadd.s32 4294967294, %s1503_s21   ;;  %s1503_s21 = sphi %s1550_s21, %s2071_s21   ;;  %s1499_s20 = sphi %s1548_s20, %s2070_s20   ;;  %s1495_s19 = sphi %s1546_s19, %s2069_s19   ;;  %s1491_s18 = sphi %s1544_s18, %s2068_s18  }
   0xa   : > { %p43_p0 = scmp.ne.s32.totalorder %s1495_s19, %s1491_s18  ;;  %p44_p1 = scmp.eq.s32.totalorder %s1565_s22, 0 }
   0xb   : > { %p151_p2 = scmp.eq.s32.totalorder %s1565_s22, 1  ;;  %p157_p3 = scmp.eq.s32.totalorder %s1175_s23, 1 }
   0xc   : > { %p1574_p4 = por %p44_p1, %p43_p0  ;;  %p1176_p5 = scmp.ge.s32.totalorder %s1503_s21, 1 }
   0xd   : > { %p1579_p6 = por %p157_p3, %p43_p0  ;;  %p164_p7 = scmp.lt.s32.totalorder %s1503_s21, 3 }
   0xe   : > { %s2060_s1 = sld [smem:[#allocation15_spill]]  ;;  %s1505_s30 = smov [#allocation5]  }
   0xf   : > { %p1587_p8 = pnand %p1176_p5, %p164_p7  ;;  %s177_s6 = sshll.u32 %s1505_s30, 4  ;;  %s178_s6 = int_to_ptr.vmem [resolvable:$true] %s177_s6 }
  0x10   : > { %s190_s10 = sshll.u32 %s2051_s2, 4  ;;  %s1506_s11 = smov 512   ;;  %s191_s10 = int_to_ptr.hbm [resolvable:$true] %s190_s10 }
  0x11   : > { %p1241_p9 = pneg %p1587_p8  ;;  %s1507_s12 = smov 32  }
  0x12   : > { %s1508_s13 = smov [#allocation7]   ;;  %s201_s17 = sshll.u32 %s2052_s3, 4  ;;  %s202_s17 = int_to_ptr.hbm [resolvable:$true] %s201_s17 }
  0x13   : > { %p1595_p10 = pnand %p1241_p9, %p44_p1  ;;  %s192_s14 = sshll.u32 %s1508_s13, 4  ;;  %s193_s14 = int_to_ptr.vmem [resolvable:$true] %s192_s14 }
  0x14   : > { %s175_s28 = sshll.u32 %s2060_s1, 4  ;;  %s1509_s23 = smov [#allocation8]   ;;  %s176_s28 = int_to_ptr.hbm [resolvable:$true] %s175_s28 }
  0x15   : > { %1244 = dma.hbm_to_vmem [thread:$0]  (!%p1595_p10), %s176_s28, 8192, %s178_s6, [#allocation6], %s1506_s11, %s1506_s11, %s1507_s12  }
  0x16   : > { %1247 = dma.hbm_to_vmem [thread:$0]  (!%p1595_p10), %s191_s10, 64, %s193_s14, [#allocation6]  }
  0x17   : > { %s203_s26 = sshll.u32 %s1509_s23, 4  ;;  %s2055_s27 = smov 128   ;;  %s204_s26 = int_to_ptr.vmem [resolvable:$true] %s203_s26 }
  0x18   : > { %s2056_s28 = smov 8   ;;  %s1616_s30 = sadd.s32 1, %s1503_s21  }
  0x19   : > { %1250 = dma.hbm_to_vmem [thread:$0]  (!%p1595_p10), %s202_s17, 4096, %s204_s26, [#allocation9], %s2055_s27, %s2055_s27, %s2056_s28  }
  0x1a   : > { %s27_s6 = ssub.s32 %s1503_s21, %s1616_s30  ;;  %s30_s8 = sadd.s32 1, %s1499_s20 }
  0x1b   : > { %p28_p12 = scmp.eq.s32.totalorder %s27_s6, 0  ;;  %p37_p13 = scmp.ne.s32.totalorder %s1499_s20, %s1495_s19 }
  0x1c   : > { %p38_p0 = scmp.eq.s32.totalorder %s1503_s21, 0  ;;  %p1262_p3 = scmp.lt.s32.totalorder %s1503_s21, 2 }
  0x1d   : > { %s1626_s9 = scalar_select %p28_p12, %s1499_s20, %s30_s8  }
  0x1e   : > { %p39_p5 = por %p38_p0, %p37_p13  ;;  %p1630_p7 = por %p151_p2, %p37_p13 }
  0x1f   : > { %s220_s7 = sand.u32 1, %s1499_s20   ;;  %s1189_s11 = smul.u32 200, %s1503_s21 }
  0x20   : > { %s1223_s12 = smul.u32 200, %s220_s7  ;;  %p1639_p9 = pnand %p1262_p3, %p39_p5 }
  0x21   : > { %s229_s15 = scalar_lea.hbm %s2049_s0, %s1189_s11  ;;  %s221_s6 = scalar_lea.sflag [#allocation3], %s220_s7 }
  0x22   : > { %s230_s17 = sshll.u32 %s229_s15, 4  ;;  %s224_s23 = scalar_lea.vmem [#allocation2], %s1223_s12  ;;  %s231_s17 = int_to_ptr.hbm [resolvable:$true] %s230_s17 }
  0x23   : > { %s232_s26 = sshll.u32 %s224_s23, 4  ;;  %s1399_s8 = sshra.s32 %s231_s17, 4  ;;  %s233_s26 = int_to_ptr.vmem [resolvable:$true] %s232_s26  ;;  %s1400_s8 = int_to_ptr.hbm [resolvable:$true] %s1399_s8 }
  0x24   : > { %s1401_s27 = scalar_lea.hbm %s1400_s8, 200  ;;  %p1403_p10 = pneg %p1639_p9 }
  0x25   : > { %p1402_p2 = scmp.ne.s32.totalorder %s1400_s8, %s1401_s27  ;;  %s1406_s14 = scalar_lea.hbm %s2049_s0, 400 }
  0x26   : > { %p1407_p0 = scmp.lt.s32.totalorder %s1400_s8, %s2049_s0  ;;  %p1408_p3 = scmp.lt.s32.totalorder %s1406_s14, %s1401_s27 }
  0x27   : > { %p1404_p12 = pnand %p1403_p10, %p1402_p2 }
  0x28   : > { %p1409_p5 = por %p1408_p3, %p1407_p0 }
  0x29   : > { %p1405_p13 = pneg %p1404_p12 }
  0x2b   : > { %p1410_p11 = pnand %p1409_p5, %p1405_p13 }
  0x2d   : > { %1413 = shalt.err (!%p1410_p11)
}
  0x2e   : > { %s2065_s7 = smov 8   ;;  %s2066_s12 = smov 128  }
  0x2f   : > { %1254 = dma.hbm_to_vmem [thread:$0]  (!%p1639_p9), %s231_s17, 3200, %s233_s26, %s221_s6, %s2066_s12, %s2066_s12, %s2065_s7  }
  0x30   : > { %244 = sbr.rel (%p1587_p8) target bundleno = 649 (0x289), region = 40  ;;  %s1659_s15 = sand.u32 (!%p1587_p8), 1, %s1495_s19  }
  0x31   : > { %s1224_s1 = smul.u32 (!%p1587_p8), 200, %s1659_s15  ;;  %s247_s27 = scalar_lea.sflag (!%p1587_p8), [#allocation3], %s1659_s15 }
  0x33   : > { %s1665_s28 = scalar_lea.vmem (!%p1587_p8), [#allocation2], %s1224_s1 }
  0x35   : > { %1474 = dma.done.wait (%p1574_p4), %s247_s27, 3200  }
  0x36   : > { %1476 = vsyncadd (%p1574_p4), %s247_s27, 4294964096 }
  0x37   : > { %1478 = dma.done.wait (%p44_p1), [#allocation6], 8256  }
  0x38   : > { %1480 = vsyncadd (%p44_p1), [#allocation6], 4294959040 }
  0x39   : > { %1482 = dma.done.wait (%p44_p1), [#allocation9], 4096  }
  0x3a   : > { %1484 = vsyncadd (%p44_p1), [#allocation9], 4294963200  ;;  %v380_v0 = vld [vmem:[#allocation5 + $0x1e0] sm:$0xff]  ;;  %v381_v1 = vld [vmem:[#allocation5 + $0x1e8] sm:$0xff]  ;;  %s1916_s16 = scalar_lea.vmem [#allocation10], %s1224_s1  ;;  %s1190_s17 = smul.u32 200, %s1565_s22 }
  0x3b   : > { %v376_v2 = vld [vmem:[#allocation5 + $0x1c0] sm:$0xff]  ;;  %1191 = vmatpush.msra.mxu2 %v380_v0  ;;  %1207 = vmatpush.msra.mxu3 %v381_v1  ;;  %v377_v3 = vld [vmem:[#allocation5 + $0x1c8] sm:$0xff]  ;;  %v382_v33 = vld [vmem:[#allocation5 + $0x1f0] sm:$0xff]  ;;  %s1070_s8 = sshll.u32 %s1916_s16, 4  ;;  %s1058_s22 = scalar_lea.sflag [#allocation4], %s1659_s15  ;;  %s1071_s8 = int_to_ptr.vmem [resolvable:$true] %s1070_s8 }
  0x3c   : > { %v372_v4 = vld [vmem:[#allocation5 + $0x1a0] sm:$0xff]  ;;  %v373_v5 = vld [vmem:[#allocation5 + $0x1a8] sm:$0xff]  ;;  %394 = vmatpush.msra.mxu0 %v380_v0  ;;  %486 = vmatpush.msra.mxu1 %v381_v1  ;;  %v383_v34 = vld [vmem:[#allocation5 + $0x1f8] sm:$0xff]  ;;  %s1069_s6 = scalar_lea.hbm %s2054_s5, %s1190_s17  ;;  %s1449_s1 = scalar_lea.hbm %s2054_s5, 400 }
  0x3d   : > { %1192 = vmatpush.msra.mxu2 %v376_v2  ;;  %1208 = vmatpush.msra.mxu3 %v377_v3  ;;  %v368_v6 = vld [vmem:[#allocation5 + $0x180] sm:$0xff]  ;;  %v369_v7 = vld [vmem:[#allocation5 + $0x188] sm:$0xff]  ;;  %v378_v35 = vld [vmem:[#allocation5 + $0x1d0] sm:$0xff]  ;;  %s1072_s11 = sshll.u32 %s1069_s6, 4  ;;  %s1073_s11 = int_to_ptr.hbm [resolvable:$true] %s1072_s11 }
  0x3e   : > { %395 = vmatpush.msra.mxu0 %v376_v2  ;;  %487 = vmatpush.msra.mxu1 %v377_v3  ;;  %v364_v8 = vld [vmem:[#allocation5 + $0x160] sm:$0xff]  ;;  %v365_v9 = vld [vmem:[#allocation5 + $0x168] sm:$0xff]  ;;  %v379_v36 = vld [vmem:[#allocation5 + $0x1d8] sm:$0xff]  ;;  %s1443_s13 = sshra.s32 %s1073_s11, 4  ;;  %s1444_s13 = int_to_ptr.hbm [resolvable:$true] %s1443_s13 }
  0x3f   : > { %1193 = vmatpush.msra.mxu2 %v372_v4  ;;  %1209 = vmatpush.msra.mxu3 %v373_v5  ;;  %v360_v10 = vld [vmem:[#allocation5 + $0x140] sm:$0xff]  ;;  %v361_v11 = vld [vmem:[#allocation5 + $0x148] sm:$0xff]  ;;  %v374_v37 = vld [vmem:[#allocation5 + $0x1b0] sm:$0xff]  ;;  %s1445_s14 = scalar_lea.hbm %s1444_s13, 200  ;;  %p1450_p11 = scmp.lt.s32.totalorder %s1444_s13, %s2054_s5 }
  0x40   : > { %396 = vmatpush.msra.mxu0 %v372_v4  ;;  %488 = vmatpush.msra.mxu1 %v373_v5  ;;  %v356_v12 = vld [vmem:[#allocation5 + $0x120] sm:$0xff]  ;;  %v357_v13 = vld [vmem:[#allocation5 + $0x128] sm:$0xff]  ;;  %v375_v38 = vld [vmem:[#allocation5 + $0x1b8] sm:$0xff]  ;;  %p1446_p1 = scmp.ne.s32.totalorder %s1444_s13, %s1445_s14  ;;  %p1451_p9 = scmp.lt.s32.totalorder %s1449_s1, %s1445_s14 }
  0x41   : > { %1194 = vmatpush.msra.mxu2 %v368_v6  ;;  %1210 = vmatpush.msra.mxu3 %v369_v7  ;;  %v352_v14 = vld [vmem:[#allocation5 + $0x100] sm:$0xff]  ;;  %v353_v15 = vld [vmem:[#allocation5 + $0x108] sm:$0xff]  ;;  %v370_v39 = vld [vmem:[#allocation5 + $0x190] sm:$0xff] }
  0x42   : > { %397 = vmatpush.msra.mxu0 %v368_v6  ;;  %489 = vmatpush.msra.mxu1 %v369_v7  ;;  %v348_v16 = vld [vmem:[#allocation5 + $0xe0] sm:$0xff]  ;;  %v349_v17 = vld [vmem:[#allocation5 + $0xe8] sm:$0xff]  ;;  %v371_v40 = vld [vmem:[#allocation5 + $0x198] sm:$0xff]  ;;  %p1447_p4 = pnand %p1446_p1, %p1630_p7  ;;  %p1452_p2 = por %p1451_p9, %p1450_p11 }
  0x43   : > { %1195 = vmatpush.msra.mxu2 %v364_v8  ;;  %1211 = vmatpush.msra.mxu3 %v365_v9  ;;  %v344_v18 = vld [vmem:[#allocation5 + $0xc0] sm:$0xff]  ;;  %v345_v19 = vld [vmem:[#allocation5 + $0xc8] sm:$0xff]  ;;  %v366_v42 = vld [vmem:[#allocation5 + $0x170] sm:$0xff] }
  0x44   : > { %398 = vmatpush.msra.mxu0 %v364_v8  ;;  %490 = vmatpush.msra.mxu1 %v365_v9  ;;  %v340_v20 = vld [vmem:[#allocation5 + $0xa0] sm:$0xff]  ;;  %v341_v21 = vld [vmem:[#allocation5 + $0xa8] sm:$0xff]  ;;  %v367_v43 = vld [vmem:[#allocation5 + $0x178] sm:$0xff]  ;;  %p1448_p8 = pneg %p1447_p4 }
  0x45   : > { %1196 = vmatpush.msra.mxu2 %v360_v10  ;;  %1212 = vmatpush.msra.mxu3 %v361_v11  ;;  %v336_v22 = vld [vmem:[#allocation5 + $0x80] sm:$0xff]  ;;  %v337_v23 = vld [vmem:[#allocation5 + $0x88] sm:$0xff]  ;;  %v362_v44 = vld [vmem:[#allocation5 + $0x150] sm:$0xff] }
  0x46   : > { %399 = vmatpush.msra.mxu0 %v360_v10  ;;  %491 = vmatpush.msra.mxu1 %v361_v11  ;;  %v332_v24 = vld [vmem:[#allocation5 + $0x60] sm:$0xff]  ;;  %v333_v25 = vld [vmem:[#allocation5 + $0x68] sm:$0xff]  ;;  %v363_v45 = vld [vmem:[#allocation5 + $0x158] sm:$0xff]  ;;  %p1453_p10 = pnand %p1452_p2, %p1448_p8 }
  0x47   : > { %1197 = vmatpush.msra.mxu2 %v356_v12  ;;  %1213 = vmatpush.msra.mxu3 %v357_v13  ;;  %v328_v26 = vld [vmem:[#allocation5 + $0x40] sm:$0xff]  ;;  %v329_v27 = vld [vmem:[#allocation5 + $0x48] sm:$0xff]  ;;  %v358_v46 = vld [vmem:[#allocation5 + $0x130] sm:$0xff] }
  0x48   : > { %400 = vmatpush.msra.mxu0 %v356_v12  ;;  %492 = vmatpush.msra.mxu1 %v357_v13  ;;  %v324_v28 = vld [vmem:[#allocation5 + $0x20] sm:$0xff]  ;;  %v325_v29 = vld [vmem:[#allocation5 + $0x28] sm:$0xff]  ;;  %v359_v47 = vld [vmem:[#allocation5 + $0x138] sm:$0xff] }
  0x49   : > { %1198 = vmatpush.msra.mxu2 %v352_v14  ;;  %1214 = vmatpush.msra.mxu3 %v353_v15  ;;  %v320_v30 = vld [vmem:[#allocation5] sm:$0xff]  ;;  %v321_v31 = vld [vmem:[#allocation5 + $0x8] sm:$0xff]  ;;  %v354_v48 = vld [vmem:[#allocation5 + $0x110] sm:$0xff] }
  0x4a   : > { %401 = vmatpush.msra.mxu0 %v352_v14  ;;  %493 = vmatpush.msra.mxu1 %v353_v15  ;;  %v1680_v32 = vld [vmem:[%s1665_s28 + $0x68] sm:$0xff]  ;;  %v1685_v41 = vld [vmem:[%s1665_s28 + $0x70] sm:$0xff]  ;;  %v1690_v50 = vld [vmem:[%s1665_s28 + $0x78] sm:$0xff] }
  0x4b   : > { %1199 = vmatpush.msra.mxu2 %v348_v16  ;;  %1215 = vmatpush.msra.mxu3 %v349_v17  ;;  %v355_v49 = vld [vmem:[#allocation5 + $0x118] sm:$0xff]  ;;  %v350_v51 = vld [vmem:[#allocation5 + $0xf0] sm:$0xff]  ;;  %v1705_v61 = vld [vmem:[%s1665_s28 + $0x90] sm:$0xff] }
  0x4c   : > { %402 = vmatpush.msra.mxu0 %v348_v16  ;;  %494 = vmatpush.msra.mxu1 %v349_v17  ;;  %v351_v52 = vld [vmem:[#allocation5 + $0xf8] sm:$0xff]  ;;  %v346_v53 = vld [vmem:[#allocation5 + $0xd0] sm:$0xff]  ;;  %v1727_v11 = vld [vmem:[%s1665_s28 + $0xb0] sm:$0xff] }
  0x4d   : > { %1200 = vmatpush.msra.mxu2 %v344_v18  ;;  %1216 = vmatpush.msra.mxu3 %v345_v19  ;;  %v1695_v54 = vld [vmem:[%s1665_s28 + $0x80] sm:$0xff]  ;;  %v1700_v58 = vld [vmem:[%s1665_s28 + $0x88] sm:$0xff]  ;;  %v1710_v1 = vld [vmem:[%s1665_s28 + $0x98] sm:$0xff] }
  0x4e   : > { %403 = vmatpush.msra.mxu0 %v344_v18  ;;  %495 = vmatpush.msra.mxu1 %v345_v19  ;;  %v347_v55 = vld [vmem:[#allocation5 + $0xd8] sm:$0xff]  ;;  %v342_v56 = vld [vmem:[#allocation5 + $0xb0] sm:$0xff]  ;;  %v297_v12 = vld [vmem:[%s1665_s28 + $0x10] sm:$0xff] }
  0x4f   : > { %1201 = vmatpush.msra.mxu2 %v340_v20  ;;  %1217 = vmatpush.msra.mxu3 %v341_v21  ;;  %v343_v57 = vld [vmem:[#allocation5 + $0xb8] sm:$0xff]  ;;  %v338_v59 = vld [vmem:[#allocation5 + $0x90] sm:$0xff] }
  0x50   : > { %404 = vmatpush.msra.mxu0 %v340_v20  ;;  %496 = vmatpush.msra.mxu1 %v341_v21  ;;  %v339_v60 = vld [vmem:[#allocation5 + $0x98] sm:$0xff]  ;;  %v334_v62 = vld [vmem:[#allocation5 + $0x70] sm:$0xff] }
  0x51   : > { %1202 = vmatpush.msra.mxu2 %v336_v22  ;;  %1218 = vmatpush.msra.mxu3 %v337_v23  ;;  %v335_v63 = vld [vmem:[#allocation5 + $0x78] sm:$0xff]  ;;  %v330_v0 = vld [vmem:[#allocation5 + $0x50] sm:$0xff] }
  0x52   : > { %405 = vmatpush.msra.mxu0 %v336_v22  ;;  %497 = vmatpush.msra.mxu1 %v337_v23  ;;  %v331_v2 = vld [vmem:[#allocation5 + $0x58] sm:$0xff]  ;;  %v326_v3 = vld [vmem:[#allocation5 + $0x30] sm:$0xff] }
  0x53   : > { %1203 = vmatpush.msra.mxu2 %v332_v24  ;;  %1219 = vmatpush.msra.mxu3 %v333_v25  ;;  %v327_v4 = vld [vmem:[#allocation5 + $0x38] sm:$0xff]  ;;  %v322_v6 = vld [vmem:[#allocation5 + $0x10] sm:$0xff] }
  0x54   : > { %406 = vmatpush.msra.mxu0 %v332_v24  ;;  %498 = vmatpush.msra.mxu1 %v333_v25  ;;  %v1715_v5 = vld [vmem:[%s1665_s28 + $0xa0] sm:$0xff]  ;;  %v1721_v9 = vld [vmem:[%s1665_s28 + $0xa8] sm:$0xff]  ;;  %v1733_v13 = vld [vmem:[%s1665_s28 + $0xb8] sm:$0xff] }
  0x55   : > { %1204 = vmatpush.msra.mxu2 %v328_v26  ;;  %1220 = vmatpush.msra.mxu3 %v329_v27  ;;  %v323_v7 = vld [vmem:[#allocation5 + $0x18] sm:$0xff]  ;;  %v298_v14 = vld [vmem:[%s1665_s28 + $0x18] sm:$0xff]  ;;  %v301_v24 = vld [vmem:[%s1665_s28 + $0x30] sm:$0xff] }
  0x56   : > { %407 = vmatpush.msra.mxu0 %v328_v26  ;;  %499 = vmatpush.msra.mxu1 %v329_v27  ;;  %v295_v8 = vld [vmem:[%s1665_s28] sm:$0xff]  ;;  %v296_v10 = vld [vmem:[%s1665_s28 + $0x8] sm:$0xff]  ;;  %v302_v27 = vld [vmem:[%s1665_s28 + $0x38] sm:$0xff] }
  0x57   : > { %1205 = vmatpush.msra.mxu2 %v324_v28  ;;  %1221 = vmatpush.msra.mxu3 %v325_v29  ;;  %v1739_v15 = vld [vmem:[%s1665_s28 + $0xc0] sm:$0xff]  ;;  %v300_v20 = vld [vmem:[%s1665_s28 + $0x28] sm:$0xff] }
  0x58   : > { %408 = vmatpush.msra.mxu0 %v324_v28  ;;  %500 = vmatpush.msra.mxu1 %v325_v29  ;;  %v299_v16 = vld [vmem:[%s1665_s28 + $0x20] sm:$0xff]  ;;  %v824_v25 = vld [vmem:[#allocation8 + $0x60] sm:$0xff] }
  0x59   : > { %1206 = vmatpush.msra.mxu2 %v320_v30  ;;  %1222 = vmatpush.msra.mxu3 %v321_v31  ;;  %v827_v17 = vld [vmem:[#allocation8 + $0x78] sm:$0xff]  ;;  %v826_v19 = vld [vmem:[#allocation8 + $0x70] sm:$0xff]  ;;  %v825_v22 = vld [vmem:[#allocation8 + $0x68] sm:$0xff] }
  0x5a   : > { %449 = vmatmul.f32.vlgmr.msra.gmra.mxu2 %v1680_v32  ;;  %541 = vmatmul.f32.vlgmr.msra.gmra.mxu3 %v1680_v32  ;;  %v843_v18 = vld [vmem:[#allocation8 + $0xf8] sm:$0xff]  ;;  %v842_v21 = vld [vmem:[#allocation8 + $0xf0] sm:$0xff]  ;;  %v841_v23 = vld [vmem:[#allocation8 + $0xe8] sm:$0xff] }
  0x5b   : > { %578 = vmatpush.msrb.mxu2 %v382_v33  ;;  %670 = vmatpush.msrb.mxu3 %v383_v34  ;;  %v840_v26 = vld [vmem:[#allocation8 + $0xe0] sm:$0xff]  ;;  %v823_v28 = vld [vmem:[#allocation8 + $0x58] sm:$0xff] }
  0x5c   : > { %409 = vmatpush.msra.mxu0 %v320_v30  ;;  %501 = vmatpush.msra.mxu1 %v321_v31  ;;  %v839_v29 = vld [vmem:[#allocation8 + $0xd8] sm:$0xff]  ;;  %v822_v31 = vld [vmem:[#allocation8 + $0x50] sm:$0xff] }
  0x5d   : > { %579 = vmatpush.msrb.mxu2 %v378_v35  ;;  %671 = vmatpush.msrb.mxu3 %v379_v36  ;;  %v303_v30 = vld [vmem:[%s1665_s28 + $0x40] sm:$0xff] }
  0x5e   : > { %410 = vmatmul.f32.vlgmr.msra.gmra.mxu0 %v295_v8  ;;  %502 = vmatmul.f32.vlgmr.msra.gmra.mxu1 %v295_v8  ;;  %v838_v35 = vld [vmem:[#allocation8 + $0xd0] sm:$0xff]  ;;  %v821_v36 = vld [vmem:[#allocation8 + $0x48] sm:$0xff] }
  0x5f   : > { %580 = vmatpush.msrb.mxu2 %v374_v37  ;;  %672 = vmatpush.msrb.mxu3 %v375_v38  ;;  %v304_v37 = vld [vmem:[%s1665_s28 + $0x48] sm:$0xff]  ;;  %v837_v38 = vld [vmem:[#allocation8 + $0xc8] sm:$0xff] }
  0x60   : > { %848 = vmatpush.msrb.mxu0 %v827_v17  ;;  %940 = vmatpush.msrb.mxu1 %v843_v18  ;;  %v813_v17 = vld [vmem:[#allocation8 + $0x8] sm:$0xff] }
  0x61   : > { %581 = vmatpush.msrb.mxu2 %v370_v39  ;;  %673 = vmatpush.msrb.mxu3 %v371_v40  ;;  %v829_v18 = vld [vmem:[#allocation8 + $0x88] sm:$0xff] }
  0x62   : > { %452 = vmatmul.f32.gmra.mxu2 %v1685_v41  ;;  %544 = vmatmul.f32.gmra.mxu3 %v1685_v41 }
  0x63   : > { %582 = vmatpush.msrb.mxu2 %v366_v42  ;;  %674 = vmatpush.msrb.mxu3 %v367_v43  ;;  %v820_v42 = vld [vmem:[#allocation8 + $0x40] sm:$0xff] }
  0x64   : > { %849 = vmatpush.msrb.mxu0 %v826_v19  ;;  %941 = vmatpush.msrb.mxu1 %v842_v21  ;;  %v305_v43 = vld [vmem:[%s1665_s28 + $0x50] sm:$0xff] }
  0x65   : > { %583 = vmatpush.msrb.mxu2 %v362_v44  ;;  %675 = vmatpush.msrb.mxu3 %v363_v45  ;;  %v836_v44 = vld [vmem:[#allocation8 + $0xc0] sm:$0xff] }
  0x66   : > { %413 = vmatmul.f32.gmra.mxu0 %v296_v10  ;;  %505 = vmatmul.f32.gmra.mxu1 %v296_v10  ;;  %v812_v19 = vld [vmem:[#allocation8] sm:$0xff] }
  0x67   : > { %584 = vmatpush.msrb.mxu2 %v358_v46  ;;  %676 = vmatpush.msrb.mxu3 %v359_v47  ;;  %v819_v47 = vld [vmem:[#allocation8 + $0x38] sm:$0xff] }
  0x68   : > { %850 = vmatpush.msrb.mxu0 %v825_v22  ;;  %942 = vmatpush.msrb.mxu1 %v841_v23 }
  0x69   : > { %585 = vmatpush.msrb.mxu2 %v354_v48  ;;  %677 = vmatpush.msrb.mxu3 %v355_v49  ;;  %v835_v48 = vld [vmem:[#allocation8 + $0xb8] sm:$0xff]  ;;  %v306_v49 = vld [vmem:[%s1665_s28 + $0x58] sm:$0xff] }
  0x6a   : > { %455 = vmatmul.f32.gmra.mxu2 %v1690_v50  ;;  %547 = vmatmul.f32.gmra.mxu3 %v1690_v50 }
  0x6b   : > { %586 = vmatpush.msrb.mxu2 %v350_v51  ;;  %678 = vmatpush.msrb.mxu3 %v351_v52 }
  0x6c   : > { %851 = vmatpush.msrb.mxu0 %v824_v25  ;;  %943 = vmatpush.msrb.mxu1 %v840_v26 }
  0x6d   : > { %587 = vmatpush.msrb.mxu2 %v346_v53  ;;  %679 = vmatpush.msrb.mxu3 %v347_v55  ;;  %v818_v53 = vld [vmem:[#allocation8 + $0x30] sm:$0xff] }
  0x6e   : > { %416 = vmatmul.f32.gmra.mxu0 %v297_v12  ;;  %508 = vmatmul.f32.gmra.mxu1 %v297_v12  ;;  %v834_v55 = vld [vmem:[#allocation8 + $0xb0] sm:$0xff] }
  0x6f   : > { %588 = vmatpush.msrb.mxu2 %v342_v56  ;;  %680 = vmatpush.msrb.mxu3 %v343_v57  ;;  %v307_v56 = vld [vmem:[%s1665_s28 + $0x60] sm:$0xff] }
  0x70   : > { %852 = vmatpush.msrb.mxu0 %v823_v28  ;;  %944 = vmatpush.msrb.mxu1 %v839_v29  ;;  %v817_v57 = vld [vmem:[#allocation8 + $0x28] sm:$0xff] }
  0x71   : > { %589 = vmatpush.msrb.mxu2 %v338_v59  ;;  %681 = vmatpush.msrb.mxu3 %v339_v60 }
  0x72   : > { %458 = vmatmul.f32.gmra.mxu2 %v1695_v54  ;;  %550 = vmatmul.f32.gmra.mxu3 %v1695_v54 }
  0x73   : > { %590 = vmatpush.msrb.mxu2 %v334_v62  ;;  %682 = vmatpush.msrb.mxu3 %v335_v63  ;;  %v833_v62 = vld [vmem:[#allocation8 + $0xa8] sm:$0xff]  ;;  %v816_v63 = vld [vmem:[#allocation8 + $0x20] sm:$0xff] }
  0x74   : > { %853 = vmatpush.msrb.mxu0 %v822_v31  ;;  %945 = vmatpush.msrb.mxu1 %v838_v35 }
  0x75   : > { %591 = vmatpush.msrb.mxu2 %v330_v0  ;;  %683 = vmatpush.msrb.mxu3 %v331_v2  ;;  %v832_v0 = vld [vmem:[#allocation8 + $0xa0] sm:$0xff] }
  0x76   : > { %419 = vmatmul.f32.gmra.mxu0 %v298_v14  ;;  %511 = vmatmul.f32.gmra.mxu1 %v298_v14 }
  0x77   : > { %592 = vmatpush.msrb.mxu2 %v326_v3  ;;  %684 = vmatpush.msrb.mxu3 %v327_v4  ;;  %v815_v4 = vld [vmem:[#allocation8 + $0x18] sm:$0xff] }
  0x78   : > { %854 = vmatpush.msrb.mxu0 %v821_v36  ;;  %946 = vmatpush.msrb.mxu1 %v837_v38 }
  0x79   : > { %593 = vmatpush.msrb.mxu2 %v322_v6  ;;  %685 = vmatpush.msrb.mxu3 %v323_v7  ;;  %v831_v6 = vld [vmem:[#allocation8 + $0x98] sm:$0xff] }
  0x7a   : > { %461 = vmatmul.f32.gmra.mxu2 %v1700_v58  ;;  %553 = vmatmul.f32.gmra.mxu3 %v1700_v58 }
  0x7b   : > { %855 = vmatpush.msrb.mxu0 %v820_v42  ;;  %947 = vmatpush.msrb.mxu1 %v836_v44 }
  0x7d   : > { %856 = vmatpush.msrb.mxu0 %v819_v47  ;;  %948 = vmatpush.msrb.mxu1 %v835_v48 }
  0x7e   : > { %422 = vmatmul.f32.gmra.mxu0 %v299_v16  ;;  %514 = vmatmul.f32.gmra.mxu1 %v299_v16 }
  0x7f   : > { %857 = vmatpush.msrb.mxu0 %v818_v53  ;;  %949 = vmatpush.msrb.mxu1 %v834_v55 }
  0x81   : > { %858 = vmatpush.msrb.mxu0 %v817_v57  ;;  %950 = vmatpush.msrb.mxu1 %v833_v62 }
  0x82   : > { %464 = vmatmul.f32.gmra.mxu2 %v1705_v61  ;;  %556 = vmatmul.f32.gmra.mxu3 %v1705_v61 }
  0x83   : > { %859 = vmatpush.msrb.mxu0 %v816_v63  ;;  %951 = vmatpush.msrb.mxu1 %v832_v0 }
  0x85   : > { %860 = vmatpush.msrb.mxu0 %v815_v4  ;;  %952 = vmatpush.msrb.mxu1 %v831_v6 }
  0x86   : > { %517 = vmatmul.f32.gmra.mxu1 %v300_v20  ;;  %425 = vmatmul.f32.gmra.mxu0 %v300_v20 }
  0x8a   : > { %467 = vmatmul.f32.gmra.mxu2 %v1710_v1  ;;  %559 = vmatmul.f32.gmra.mxu3 %v1710_v1 }
  0x8e   : > { %428 = vmatmul.f32.gmra.mxu0 %v301_v24  ;;  %520 = vmatmul.f32.gmra.mxu1 %v301_v24 }
  0x92   : > { %470 = vmatmul.f32.gmra.mxu2 %v1715_v5  ;;  %562 = vmatmul.f32.gmra.mxu3 %v1715_v5 }
  0x96   : > { %431 = vmatmul.f32.gmra.mxu0 %v302_v27  ;;  %523 = vmatmul.f32.gmra.mxu1 %v302_v27 }
  0x9a   : > { %473 = vmatmul.f32.gmra.mxu2 %v1721_v9  ;;  %565 = vmatmul.f32.gmra.mxu3 %v1721_v9 }
  0x9e   : > { %434 = vmatmul.f32.gmra.mxu0 %v303_v30  ;;  %526 = vmatmul.f32.gmra.mxu1 %v303_v30 }
  0xa2   : > { %476 = vmatmul.f32.gmra.mxu2 %v1727_v11  ;;  %568 = vmatmul.f32.gmra.mxu3 %v1727_v11 }
  0xa6   : > { %437 = vmatmul.f32.gmra.mxu0 %v304_v37  ;;  %529 = vmatmul.f32.gmra.mxu1 %v304_v37 }
  0xaa   : > { %479 = vmatmul.f32.gmra.mxu2 %v1733_v13  ;;  %571 = vmatmul.f32.gmra.mxu3 %v1733_v13 }
  0xae   : > { %440 = vmatmul.f32.gmra.mxu0 %v305_v43  ;;  %532 = vmatmul.f32.gmra.mxu1 %v305_v43 }
  0xb2   : > { %482 = vmatmul.f32.gmra.mxu2 %v1739_v15  ;;  %574 = vmatmul.f32.gmra.mxu3 %v1739_v15 }
  0xb6   : > { %443 = vmatmul.f32.gmra.mxu0 %v306_v49  ;;  %535 = vmatmul.f32.gmra.mxu1 %v306_v49 }
  0xba   : > { %594 = vmatmul.f32.vlgmr.msrb.gmra.mxu2 %v295_v8  ;;  %686 = vmatmul.f32.vlgmr.msrb.gmra.mxu3 %v295_v8 }
  0xbe   : > { %446 = vmatmul.f32.gmra.mxu0 %v307_v56  ;;  %538 = vmatmul.f32.gmra.mxu1 %v307_v56 }
  0xc2   : > { %597 = vmatmul.f32.gmra.mxu2 %v296_v10  ;;  %689 = vmatmul.f32.gmra.mxu3 %v296_v10  ;;  %v814_v10 = vld [vmem:[#allocation8 + $0x10] sm:$0xff] }
  0xc3   : > { %861 = vmatpush.msrb.mxu0 %v814_v10 }
  0xc5   : > { %862 = vmatpush.msrb.mxu0 %v813_v17 }
  0xc7   : > { %863 = vmatpush.msrb.mxu0 %v812_v19 }
  0xca   : > { %600 = vmatmul.f32.gmra.mxu2 %v297_v12  ;;  %692 = vmatmul.f32.gmra.mxu3 %v297_v12  ;;  %v830_v12 = vld [vmem:[#allocation8 + $0x90] sm:$0xff] }
  0xcb   : > { %953 = vmatpush.msrb.mxu1 %v830_v12 }
  0xcd   : > { %954 = vmatpush.msrb.mxu1 %v829_v18 }
  0xd2   : > { %603 = vmatmul.f32.gmra.mxu2 %v298_v14  ;;  %695 = vmatmul.f32.gmra.mxu3 %v298_v14 }
  0xda   : > { %606 = vmatmul.f32.gmra.mxu2 %v299_v16  ;;  %698 = vmatmul.f32.gmra.mxu3 %v299_v16 }
  0xdb   : > { %v411_v22 = vpop.f32.mrf.mxu0  ;;  %v503_v23 = vpop.f32.mrf.mxu1 }
  0xdd   : > { %v1748_v33 = vpop.f32.mrf.mxu2  ;;  %v1750_v34 = vpop.f32.mrf.mxu3 }
  0xe2   : > { %609 = vmatmul.f32.gmra.mxu2 %v300_v20  ;;  %701 = vmatmul.f32.gmra.mxu3 %v300_v20 }
  0xe3   : > { %v506_v28 = vpop.f32.mrf.mxu1 }
  0xe5   : > { %v1753_v39 = vpop.f32.mrf.mxu2  ;;  %v1755_v40 = vpop.f32.mrf.mxu3 }
  0xea   : > { %612 = vmatmul.f32.gmra.mxu2 %v301_v24  ;;  %704 = vmatmul.f32.gmra.mxu3 %v301_v24  ;;  %v828_v24 = vld [vmem:[#allocation8 + $0x80] sm:$0xff] }
  0xeb   : > { %955 = vmatpush.msrb.mxu1 %v828_v24 }
  0xed   : > { %v1758_v45 = vpop.f32.mrf.mxu2  ;;  %v1760_v46 = vpop.f32.mrf.mxu3 }
  0xf2   : > { %615 = vmatmul.f32.gmra.mxu2 %v302_v27  ;;  %707 = vmatmul.f32.gmra.mxu3 %v302_v27  ;;  %v414_v27 = vpop.f32.mrf.mxu0 }
  0xf5   : > { %v1763_v51 = vpop.f32.mrf.mxu2  ;;  %v1765_v52 = vpop.f32.mrf.mxu3 }
  0xfa   : > { %618 = vmatmul.f32.gmra.mxu2 %v303_v30  ;;  %710 = vmatmul.f32.gmra.mxu3 %v303_v30  ;;  %v417_v31 = vpop.f32.mrf.mxu0 }
  0xfd   : > { %v1768_v59 = vpop.f32.mrf.mxu2  ;;  %v1770_v60 = vpop.f32.mrf.mxu3 }
 0x102   : > { %621 = vmatmul.f32.gmra.mxu2 %v304_v37  ;;  %713 = vmatmul.f32.gmra.mxu3 %v304_v37  ;;  %v384_v37 = vld [vmem:[#allocation7] sm:$0xf]  ;;  %v420_v55 = vpop.f32.mrf.mxu0 }
 0x103   : > { %v1806_v38 = vperm.slane %v384_v37, 0  ;;  %v1812_v42 = vperm.slane %v384_v37, 2 }
 0x105   : > { %v1772_v2 = vpop.f32.mrf.mxu2  ;;  %v1774_v3 = vpop.f32.mrf.mxu3 }
 0x10a   : > { %624 = vmatmul.f32.gmra.mxu2 %v305_v43  ;;  %716 = vmatmul.f32.gmra.mxu3 %v305_v43  ;;  %v1814_v43 = vperm.slane %v384_v37, 3  ;;  %v423_v18 = vpop.f32.mrf.mxu0 }
 0x10d   : > { %v1776_v7 = vpop.f32.mrf.mxu2  ;;  %v1778_v8 = vpop.f32.mrf.mxu3 }
 0x112   : > { %627 = vmatmul.f32.gmra.mxu2 %v306_v49  ;;  %719 = vmatmul.f32.gmra.mxu3 %v306_v49 }
 0x115   : > { %v1780_v14 = vpop.f32.mrf.mxu2  ;;  %v1782_v16 = vpop.f32.mrf.mxu3 }
 0x11a   : > { %630 = vmatmul.f32.gmra.mxu2 %v307_v56  ;;  %722 = vmatmul.f32.gmra.mxu3 %v307_v56 }
 0x11d   : > { %v1784_v20 = vpop.f32.mrf.mxu2  ;;  %v1786_v21 = vpop.f32.mrf.mxu3 }
 0x122   : > { %633 = vmatmul.f32.gmra.mxu2 %v1680_v32  ;;  %725 = vmatmul.f32.gmra.mxu3 %v1680_v32  ;;  %v509_v32 = vpop.f32.mrf.mxu1 }
 0x125   : > { %v1790_v25 = vpop.f32.mrf.mxu2  ;;  %v1792_v26 = vpop.f32.mrf.mxu3 }
 0x12a   : > { %636 = vmatmul.f32.gmra.mxu2 %v1685_v41  ;;  %728 = vmatmul.f32.gmra.mxu3 %v1685_v41  ;;  %v1808_v41 = vperm.slane %v384_v37, 1  ;;  %v512_v56 = vpop.f32.mrf.mxu1 }
 0x12c   : > { %v504_v44 = vadd.f32 %v503_v23, %v1808_v41  ;;  %v507_v63 = vadd.f32 %v506_v28, %v1808_v41 }
 0x12d   : > { %v1796_v29 = vpop.f32.mrf.mxu2  ;;  %v1798_v30 = vpop.f32.mrf.mxu3 }
 0x132   : > { %639 = vmatmul.f32.gmra.mxu2 %v1690_v50  ;;  %731 = vmatmul.f32.gmra.mxu3 %v1690_v50  ;;  %v412_v50 = vadd.f32 %v411_v22, %v1806_v38  ;;  %v515_v19 = vpop.f32.mrf.mxu1  ;;  %v510_v22 = vadd.f32 %v509_v32, %v1808_v41  ;;  %v513_v32 = vadd.f32 %v512_v56, %v1808_v41 }
 0x135   : > { %v1802_v35 = vpop.f32.mrf.mxu2  ;;  %v1804_v36 = vpop.f32.mrf.mxu3 }
 0x13a   : > { %642 = vmatmul.f32.gmra.mxu2 %v1695_v54  ;;  %734 = vmatmul.f32.gmra.mxu3 %v1695_v54  ;;  %v415_v54 = vadd.f32 %v414_v27, %v1806_v38 }
 0x13d   : > { %v595_v47 = vpop.f32.mrf.mxu2  ;;  %v687_v48 = vpop.f32.mrf.mxu3 }
 0x13e   : > { %v596_v49 = vadd.f32 %v595_v47, %v1812_v42  ;;  %v688_v53 = vadd.f32 %v687_v48, %v1814_v43 }
 0x140   : > { %v762_v57 = vmul.f32 %v596_v49, %v412_v50  ;;  %v763_v62 = vmul.f32 %v688_v53, %v504_v44  ;;  %v426_v44 = vpop.f32.mrf.mxu0 }
 0x142   : > { %645 = vmatmul.f32.gmra.mxu2 %v1700_v58  ;;  %737 = vmatmul.f32.gmra.mxu3 %v1700_v58  ;;  %v418_v58 = vadd.f32 %v417_v31, %v1806_v38  ;;  %v421_v31 = vadd.f32 %v420_v55, %v1806_v38  ;;  %v516_v55 = vadd.f32 %v515_v19, %v1808_v41 }
 0x143   : > { %864 = vmatmul.f32.vlgmr.msrb.gmra.mxu0 %v762_v57  ;;  %956 = vmatmul.f32.vlgmr.msrb.gmra.mxu1 %v763_v62 }
 0x145   : > { %v598_v0 = vpop.f32.mrf.mxu2  ;;  %v690_v4 = vpop.f32.mrf.mxu3 }
 0x146   : > { %v599_v6 = vadd.f32 %v598_v0, %v1812_v42  ;;  %v691_v10 = vadd.f32 %v690_v4, %v1814_v43 }
 0x148   : > { %v764_v12 = vmul.f32 %v599_v6, %v415_v54  ;;  %v765_v17 = vmul.f32 %v691_v10, %v507_v63  ;;  %v429_v54 = vpop.f32.mrf.mxu0 }
 0x14a   : > { %648 = vmatmul.f32.gmra.mxu2 %v1705_v61  ;;  %740 = vmatmul.f32.gmra.mxu3 %v1705_v61  ;;  %v518_v61 = vpop.f32.mrf.mxu1 }
 0x14b   : > { %867 = vmatmul.f32.gmra.mxu0 %v764_v12  ;;  %959 = vmatmul.f32.gmra.mxu1 %v765_v17  ;;  %v519_v17 = vadd.f32 %v518_v61, %v1808_v41 }
 0x14d   : > { %v601_v23 = vpop.f32.mrf.mxu2  ;;  %v693_v24 = vpop.f32.mrf.mxu3 }
 0x14e   : > { %v602_v27 = vadd.f32 %v601_v23, %v1812_v42  ;;  %v694_v28 = vadd.f32 %v693_v24, %v1814_v43 }
 0x150   : > { %v766_v37 = vmul.f32 %v602_v27, %v418_v58  ;;  %v767_v50 = vmul.f32 %v694_v28, %v510_v22  ;;  %v432_v23 = vpop.f32.mrf.mxu0 }
 0x152   : > { %651 = vmatmul.f32.gmra.mxu2 %v1710_v1  ;;  %743 = vmatmul.f32.gmra.mxu3 %v1710_v1  ;;  %v424_v1 = vadd.f32 %v423_v18, %v1806_v38  ;;  %v521_v56 = vpop.f32.mrf.mxu1 }
 0x153   : > { %870 = vmatmul.f32.gmra.mxu0 %v766_v37  ;;  %962 = vmatmul.f32.gmra.mxu1 %v767_v50  ;;  %v522_v37 = vadd.f32 %v521_v56, %v1808_v41 }
 0x155   : > { %v604_v47 = vpop.f32.mrf.mxu2  ;;  %v696_v48 = vpop.f32.mrf.mxu3 }
 0x156   : > { %v605_v49 = vadd.f32 %v604_v47, %v1812_v42  ;;  %v697_v53 = vadd.f32 %v696_v48, %v1814_v43 }
 0x158   : > { %v768_v57 = vmul.f32 %v605_v49, %v421_v31  ;;  %v769_v62 = vmul.f32 %v697_v53, %v513_v32  ;;  %v435_v48 = vpop.f32.mrf.mxu0 }
 0x15a   : > { %654 = vmatmul.f32.gmra.mxu2 %v1715_v5  ;;  %746 = vmatmul.f32.gmra.mxu3 %v1715_v5  ;;  %v427_v5 = vadd.f32 %v426_v44, %v1806_v38  ;;  %v524_v24 = vpop.f32.mrf.mxu1 }
 0x15b   : > { %873 = vmatmul.f32.gmra.mxu0 %v768_v57  ;;  %965 = vmatmul.f32.gmra.mxu1 %v769_v62  ;;  %v525_v53 = vadd.f32 %v524_v24, %v1808_v41 }
 0x15d   : > { %v607_v63 = vpop.f32.mrf.mxu2  ;;  %v699_v0 = vpop.f32.mrf.mxu3 }
 0x15e   : > { %v608_v4 = vadd.f32 %v607_v63, %v1812_v42  ;;  %v700_v6 = vadd.f32 %v699_v0, %v1814_v43  ;;  %v436_v0 = vadd.f32 %v435_v48, %v1806_v38 }
 0x160   : > { %v770_v10 = vmul.f32 %v608_v4, %v424_v1  ;;  %v771_v12 = vmul.f32 %v700_v6, %v516_v55  ;;  %v438_v63 = vpop.f32.mrf.mxu0 }
 0x162   : > { %657 = vmatmul.f32.gmra.mxu2 %v1721_v9  ;;  %749 = vmatmul.f32.gmra.mxu3 %v1721_v9  ;;  %v430_v9 = vadd.f32 %v429_v54, %v1806_v38  ;;  %v527_v49 = vpop.f32.mrf.mxu1 }
 0x163   : > { %876 = vmatmul.f32.gmra.mxu0 %v770_v10  ;;  %968 = vmatmul.f32.gmra.mxu1 %v771_v12  ;;  %v528_v4 = vadd.f32 %v527_v49, %v1808_v41 }
 0x165   : > { %v610_v18 = vpop.f32.mrf.mxu2  ;;  %v702_v19 = vpop.f32.mrf.mxu3 }
 0x166   : > { %v611_v58 = vadd.f32 %v610_v18, %v1812_v42  ;;  %v703_v22 = vadd.f32 %v702_v19, %v1814_v43 }
 0x168   : > { %v772_v27 = vmul.f32 %v611_v58, %v427_v5  ;;  %v773_v28 = vmul.f32 %v703_v22, %v519_v17  ;;  %v441_v58 = vpop.f32.mrf.mxu0 }
 0x16a   : > { %660 = vmatmul.f32.gmra.mxu2 %v1727_v11  ;;  %752 = vmatmul.f32.gmra.mxu3 %v1727_v11  ;;  %v433_v11 = vadd.f32 %v432_v23, %v1806_v38 }
 0x16b   : > { %879 = vmatmul.f32.gmra.mxu0 %v772_v27  ;;  %971 = vmatmul.f32.gmra.mxu1 %v773_v28 }
 0x16d   : > { %v613_v50 = vpop.f32.mrf.mxu2  ;;  %v705_v44 = vpop.f32.mrf.mxu3 }
 0x16e   : > { %v614_v61 = vadd.f32 %v613_v50, %v1812_v42  ;;  %v706_v31 = vadd.f32 %v705_v44, %v1814_v43  ;;  %v442_v50 = vadd.f32 %v441_v58, %v1806_v38 }
 0x170   : > { %v774_v32 = vmul.f32 %v614_v61, %v430_v9  ;;  %v775_v47 = vmul.f32 %v706_v31, %v522_v37  ;;  %v444_v48 = vpop.f32.mrf.mxu0 }
 0x172   : > { %663 = vmatmul.f32.gmra.mxu2 %v1733_v13  ;;  %755 = vmatmul.f32.gmra.mxu3 %v1733_v13  ;;  %v530_v13 = vpop.f32.mrf.mxu1 }
 0x173   : > { %882 = vmatmul.f32.gmra.mxu0 %v774_v32  ;;  %974 = vmatmul.f32.gmra.mxu1 %v775_v47  ;;  %v531_v19 = vadd.f32 %v530_v13, %v1808_v41 }
 0x175   : > { %v616_v57 = vpop.f32.mrf.mxu2  ;;  %v708_v62 = vpop.f32.mrf.mxu3 }
 0x176   : > { %v617_v1 = vadd.f32 %v616_v57, %v1812_v42  ;;  %v709_v55 = vadd.f32 %v708_v62, %v1814_v43  ;;  %v445_v57 = vadd.f32 %v444_v48, %v1806_v38 }
 0x178   : > { %v776_v54 = vmul.f32 %v617_v1, %v433_v11  ;;  %v777_v56 = vmul.f32 %v709_v55, %v525_v53 }
 0x17a   : > { %666 = vmatmul.f32.gmra.mxu2 %v1739_v15  ;;  %758 = vmatmul.f32.gmra.mxu3 %v1739_v15  ;;  %v439_v15 = vadd.f32 %v438_v63, %v1806_v38  ;;  %v533_v22 = vpop.f32.mrf.mxu1 }
 0x17b   : > { %885 = vmatmul.f32.gmra.mxu0 %v776_v54  ;;  %977 = vmatmul.f32.gmra.mxu1 %v777_v56  ;;  %v534_v44 = vadd.f32 %v533_v22, %v1808_v41 }
 0x17d   : > { %v619_v6 = vpop.f32.mrf.mxu2  ;;  %v711_v10 = vpop.f32.mrf.mxu3 }
 0x17e   : > { %v620_v12 = vadd.f32 %v619_v6, %v1812_v42  ;;  %v712_v5 = vadd.f32 %v711_v10, %v1814_v43 }
 0x180   : > { %v778_v17 = vmul.f32 %v620_v12, %v436_v0  ;;  %v779_v18 = vmul.f32 %v712_v5, %v528_v4  ;;  %v447_v0 = vpop.f32.mrf.mxu0 }
 0x181   : > { %v448_v6 = vadd.f32 %v447_v0, %v1806_v38 }
 0x182   : > { %v536_v49 = vpop.f32.mrf.mxu1 }
 0x183   : > { %888 = vmatmul.f32.gmra.mxu0 %v778_v17  ;;  %980 = vmatmul.f32.gmra.mxu1 %v779_v18  ;;  %v537_v62 = vadd.f32 %v536_v49, %v1808_v41 }
 0x185   : > { %v622_v23 = vpop.f32.mrf.mxu2  ;;  %v714_v24 = vpop.f32.mrf.mxu3 }
 0x186   : > { %v623_v27 = vadd.f32 %v622_v23, %v1812_v42  ;;  %v715_v28 = vadd.f32 %v714_v24, %v1814_v43  ;;  %v451_v23 = vadd.f32 %v1748_v33, %v1806_v38  ;;  %v543_v24 = vadd.f32 %v1750_v34, %v1808_v41 }
 0x188   : > { %v780_v9 = vmul.f32 %v623_v27, %v439_v15  ;;  %v781_v37 = vmul.f32 %v715_v28, %v531_v19 }
 0x18a   : > { %v539_v4 = vpop.f32.mrf.mxu1 }
 0x18b   : > { %891 = vmatmul.f32.gmra.mxu0 %v780_v9  ;;  %983 = vmatmul.f32.gmra.mxu1 %v781_v37  ;;  %v540_v10 = vadd.f32 %v539_v4, %v1808_v41 }
 0x18d   : > { %v625_v61 = vpop.f32.mrf.mxu2  ;;  %v717_v31 = vpop.f32.mrf.mxu3 }
 0x18e   : > { %v626_v32 = vadd.f32 %v625_v61, %v1812_v42  ;;  %v718_v47 = vadd.f32 %v717_v31, %v1814_v43  ;;  %v454_v61 = vadd.f32 %v1753_v39, %v1806_v38  ;;  %v546_v31 = vadd.f32 %v1755_v40, %v1808_v41 }
 0x190   : > { %v782_v11 = vmul.f32 %v626_v32, %v442_v50  ;;  %v783_v53 = vmul.f32 %v718_v47, %v534_v44 }
 0x193   : > { %894 = vmatmul.f32.gmra.mxu0 %v782_v11  ;;  %986 = vmatmul.f32.gmra.mxu1 %v783_v53  ;;  %v457_v11 = vadd.f32 %v1758_v45, %v1806_v38  ;;  %v549_v53 = vadd.f32 %v1760_v46, %v1808_v41  ;;  %v460_v45 = vadd.f32 %v1763_v51, %v1806_v38 }
 0x194   : > { %v552_v46 = vadd.f32 %v1765_v52, %v1808_v41 }
 0x195   : > { %v628_v1 = vpop.f32.mrf.mxu2  ;;  %v720_v55 = vpop.f32.mrf.mxu3 }
 0x196   : > { %v629_v54 = vadd.f32 %v628_v1, %v1812_v42  ;;  %v721_v56 = vadd.f32 %v720_v55, %v1814_v43 }
 0x198   : > { %v784_v63 = vmul.f32 %v629_v54, %v445_v57  ;;  %v785_v13 = vmul.f32 %v721_v56, %v537_v62  ;;  %v1905_v54 = vld [vmem:[%s2053_s4] ss:$0 sm:$0xff] }
 0x19b   : > { %897 = vmatmul.f32.gmra.mxu0 %v784_v63  ;;  %989 = vmatmul.f32.gmra.mxu1 %v785_v13 }
 0x19d   : > { %v631_v12 = vpop.f32.mrf.mxu2  ;;  %v723_v5 = vpop.f32.mrf.mxu3 }
 0x19e   : > { %v632_v17 = vadd.f32 %v631_v12, %v1812_v42  ;;  %v724_v18 = vadd.f32 %v723_v5, %v1814_v43  ;;  %v463_v5 = vadd.f32 %v1768_v59, %v1806_v38 }
 0x1a0   : > { %v786_v15 = vmul.f32 %v632_v17, %v448_v6  ;;  %v787_v19 = vmul.f32 %v724_v18, %v540_v10  ;;  %v555_v17 = vadd.f32 %v1770_v60, %v1808_v41  ;;  %v466_v60 = vadd.f32 %v1772_v2, %v1806_v38 }
 0x1a3   : > { %900 = vmatmul.f32.gmra.mxu0 %v786_v15  ;;  %992 = vmatmul.f32.gmra.mxu1 %v787_v19 }
 0x1a5   : > { %v634_v58 = vpop.f32.mrf.mxu2  ;;  %v726_v22 = vpop.f32.mrf.mxu3 }
 0x1a6   : > { %v635_v27 = vadd.f32 %v634_v58, %v1812_v42  ;;  %v727_v28 = vadd.f32 %v726_v22, %v1814_v43 }
 0x1a8   : > { %v788_v9 = vmul.f32 %v635_v27, %v451_v23  ;;  %v789_v37 = vmul.f32 %v727_v28, %v543_v24 }
 0x1ab   : > { %903 = vmatmul.f32.gmra.mxu0 %v788_v9  ;;  %995 = vmatmul.f32.gmra.mxu1 %v789_v37  ;;  %v558_v9 = vadd.f32 %v1774_v3, %v1808_v41  ;;  %v469_v3 = vadd.f32 %v1776_v7, %v1806_v38 }
 0x1ad   : > { %v637_v50 = vpop.f32.mrf.mxu2  ;;  %v729_v44 = vpop.f32.mrf.mxu3 }
 0x1ae   : > { %v638_v33 = vadd.f32 %v637_v50, %v1812_v42  ;;  %v730_v34 = vadd.f32 %v729_v44, %v1814_v43 }
 0x1b0   : > { %v790_v32 = vmul.f32 %v638_v33, %v454_v61  ;;  %v791_v47 = vmul.f32 %v730_v34, %v546_v31 }
 0x1b3   : > { %906 = vmatmul.f32.gmra.mxu0 %v790_v32  ;;  %998 = vmatmul.f32.gmra.mxu1 %v791_v47 }
 0x1b5   : > { %v640_v48 = vpop.f32.mrf.mxu2  ;;  %v732_v49 = vpop.f32.mrf.mxu3 }
 0x1b6   : > { %v641_v39 = vadd.f32 %v640_v48, %v1812_v42  ;;  %v733_v40 = vadd.f32 %v732_v49, %v1814_v43  ;;  %v561_v48 = vadd.f32 %v1778_v8, %v1808_v41  ;;  %v472_v8 = vadd.f32 %v1780_v14, %v1806_v38 }
 0x1b8   : > { %v792_v57 = vmul.f32 %v641_v39, %v457_v11  ;;  %v793_v62 = vmul.f32 %v733_v40, %v549_v53 }
 0x1bb   : > { %909 = vmatmul.f32.gmra.mxu0 %v792_v57  ;;  %1001 = vmatmul.f32.gmra.mxu1 %v793_v62 }
 0x1bd   : > { %v643_v1 = vpop.f32.mrf.mxu2  ;;  %v735_v55 = vpop.f32.mrf.mxu3 }
 0x1be   : > { %v644_v56 = vadd.f32 %v643_v1, %v1812_v42  ;;  %v736_v63 = vadd.f32 %v735_v55, %v1814_v43 }
 0x1c0   : > { %v794_v13 = vmul.f32 %v644_v56, %v460_v45  ;;  %v795_v0 = vmul.f32 %v736_v63, %v552_v46  ;;  %v865_v4 = vpop.f32.mrf.mxu0  ;;  %v957_v6 = vpop.f32.mrf.mxu1  ;;  %v564_v45 = vadd.f32 %v1782_v16, %v1808_v41  ;;  %v475_v16 = vadd.f32 %v1784_v20, %v1806_v38 }
 0x1c1   : > { %v866_v10 = vadd.f32 %v1905_v54, %v865_v4 }
 0x1c3   : > { %v958_v12 = vadd.f32 %v957_v6, %v866_v10  ;;  %912 = vmatmul.f32.gmra.mxu0 %v794_v13  ;;  %1004 = vmatmul.f32.gmra.mxu1 %v795_v0 }
 0x1c5   : > { %1032 = vst [vmem:[%s1916_s16] sm:$0xff] %v958_v12  ;;  %v646_v51 = vpop.f32.mrf.mxu2  ;;  %v738_v52 = vpop.f32.mrf.mxu3 }
 0x1c6   : > { %v647_v18 = vadd.f32 %v646_v51, %v1812_v42  ;;  %v739_v15 = vadd.f32 %v738_v52, %v1814_v43  ;;  %v567_v51 = vadd.f32 %v1786_v21, %v1808_v41  ;;  %v478_v21 = vadd.f32 %v1790_v25, %v1806_v38 }
 0x1c8   : > { %v796_v19 = vmul.f32 %v647_v18, %v463_v5  ;;  %v797_v58 = vmul.f32 %v739_v15, %v555_v17  ;;  %v868_v22 = vpop.f32.mrf.mxu0  ;;  %v960_v23 = vpop.f32.mrf.mxu1 }
 0x1c9   : > { %v869_v24 = vadd.f32 %v1905_v54, %v868_v22 }
 0x1cb   : > { %v961_v27 = vadd.f32 %v960_v23, %v869_v24  ;;  %915 = vmatmul.f32.gmra.mxu0 %v796_v19  ;;  %1007 = vmatmul.f32.gmra.mxu1 %v797_v58  ;;  %v570_v24 = vadd.f32 %v1792_v26, %v1808_v41  ;;  %v481_v26 = vadd.f32 %v1796_v29, %v1806_v38 }
 0x1cd   : > { %1033 = vst [vmem:[%s1916_s16 + $0x8] sm:$0xff] %v961_v27  ;;  %v649_v28 = vpop.f32.mrf.mxu2  ;;  %v741_v59 = vpop.f32.mrf.mxu3 }
 0x1ce   : > { %v650_v37 = vadd.f32 %v649_v28, %v1812_v42  ;;  %v742_v50 = vadd.f32 %v741_v59, %v1814_v43 }
 0x1d0   : > { %v798_v44 = vmul.f32 %v650_v37, %v466_v60  ;;  %v799_v61 = vmul.f32 %v742_v50, %v558_v9  ;;  %v871_v31 = vpop.f32.mrf.mxu0  ;;  %v963_v33 = vpop.f32.mrf.mxu1 }
 0x1d1   : > { %v872_v34 = vadd.f32 %v1905_v54, %v871_v31  ;;  %v573_v31 = vadd.f32 %v1798_v30, %v1808_v41  ;;  %v484_v30 = vadd.f32 %v1802_v35, %v1806_v38 }
 0x1d3   : > { %v964_v32 = vadd.f32 %v963_v33, %v872_v34  ;;  %918 = vmatmul.f32.gmra.mxu0 %v798_v44  ;;  %1010 = vmatmul.f32.gmra.mxu1 %v799_v61 }
 0x1d5   : > { %1034 = vst [vmem:[%s1916_s16 + $0x10] sm:$0xff] %v964_v32  ;;  %v652_v47 = vpop.f32.mrf.mxu2  ;;  %v744_v2 = vpop.f32.mrf.mxu3 }
 0x1d6   : > { %v653_v49 = vadd.f32 %v652_v47, %v1812_v42  ;;  %v745_v11 = vadd.f32 %v744_v2, %v1814_v43 }
 0x1d8   : > { %v800_v53 = vmul.f32 %v653_v49, %v469_v3  ;;  %v801_v39 = vmul.f32 %v745_v11, %v561_v48  ;;  %v874_v40 = vpop.f32.mrf.mxu0  ;;  %v966_v57 = vpop.f32.mrf.mxu1 }
 0x1d9   : > { %v875_v62 = vadd.f32 %v1905_v54, %v874_v40 }
 0x1db   : > { %v967_v1 = vadd.f32 %v966_v57, %v875_v62  ;;  %921 = vmatmul.f32.gmra.mxu0 %v800_v53  ;;  %1013 = vmatmul.f32.gmra.mxu1 %v801_v39  ;;  %v576_v53 = vadd.f32 %v1804_v36, %v1808_v41 }
 0x1dd   : > { %1035 = vst [vmem:[%s1916_s16 + $0x18] sm:$0xff] %v967_v1  ;;  %v655_v55 = vpop.f32.mrf.mxu2  ;;  %v747_v7 = vpop.f32.mrf.mxu3 }
 0x1de   : > { %v656_v46 = vadd.f32 %v655_v55, %v1812_v42  ;;  %v748_v56 = vadd.f32 %v747_v7, %v1814_v43 }
 0x1e0   : > { %v802_v63 = vmul.f32 %v656_v46, %v472_v8  ;;  %v803_v13 = vmul.f32 %v748_v56, %v564_v45  ;;  %v877_v0 = vpop.f32.mrf.mxu0  ;;  %v969_v4 = vpop.f32.mrf.mxu1 }
 0x1e1   : > { %v878_v6 = vadd.f32 %v1905_v54, %v877_v0 }
 0x1e3   : > { %v970_v10 = vadd.f32 %v969_v4, %v878_v6  ;;  %924 = vmatmul.f32.gmra.mxu0 %v802_v63  ;;  %1016 = vmatmul.f32.gmra.mxu1 %v803_v13 }
 0x1e5   : > { %1036 = vst [vmem:[%s1916_s16 + $0x20] sm:$0xff] %v970_v10  ;;  %v658_v12 = vpop.f32.mrf.mxu2  ;;  %v750_v14 = vpop.f32.mrf.mxu3 }
 0x1e6   : > { %v659_v52 = vadd.f32 %v658_v12, %v1812_v42  ;;  %v751_v5 = vadd.f32 %v750_v14, %v1814_v43 }
 0x1e8   : > { %v804_v17 = vmul.f32 %v659_v52, %v475_v16  ;;  %v805_v18 = vmul.f32 %v751_v5, %v567_v51  ;;  %v880_v15 = vpop.f32.mrf.mxu0  ;;  %v972_v19 = vpop.f32.mrf.mxu1 }
 0x1e9   : > { %v881_v58 = vadd.f32 %v1905_v54, %v880_v15 }
 0x1eb   : > { %v973_v22 = vadd.f32 %v972_v19, %v881_v58  ;;  %927 = vmatmul.f32.gmra.mxu0 %v804_v17  ;;  %1019 = vmatmul.f32.gmra.mxu1 %v805_v18 }
 0x1ed   : > { %1037 = vst [vmem:[%s1916_s16 + $0x28] sm:$0xff] %v973_v22  ;;  %v661_v23 = vpop.f32.mrf.mxu2  ;;  %v753_v20 = vpop.f32.mrf.mxu3 }
 0x1ee   : > { %v662_v27 = vadd.f32 %v661_v23, %v1812_v42  ;;  %v754_v28 = vadd.f32 %v753_v20, %v1814_v43 }
 0x1f0   : > { %v806_v59 = vmul.f32 %v662_v27, %v478_v21  ;;  %v807_v60 = vmul.f32 %v754_v28, %v570_v24  ;;  %v883_v9 = vpop.f32.mrf.mxu0  ;;  %v975_v37 = vpop.f32.mrf.mxu1 }
 0x1f1   : > { %v884_v50 = vadd.f32 %v1905_v54, %v883_v9 }
 0x1f3   : > { %v976_v44 = vadd.f32 %v975_v37, %v884_v50  ;;  %930 = vmatmul.f32.gmra.mxu0 %v806_v59  ;;  %1022 = vmatmul.f32.gmra.mxu1 %v807_v60 }
 0x1f5   : > { %1038 = vst [vmem:[%s1916_s16 + $0x30] sm:$0xff] %v976_v44  ;;  %v664_v61 = vpop.f32.mrf.mxu2  ;;  %v756_v25 = vpop.f32.mrf.mxu3 }
 0x1f6   : > { %v665_v33 = vadd.f32 %v664_v61, %v1812_v42  ;;  %v757_v34 = vadd.f32 %v756_v25, %v1814_v43 }
 0x1f8   : > { %v808_v32 = vmul.f32 %v665_v33, %v481_v26  ;;  %v809_v47 = vmul.f32 %v757_v34, %v573_v31  ;;  %v886_v2 = vpop.f32.mrf.mxu0  ;;  %v978_v3 = vpop.f32.mrf.mxu1 }
 0x1f9   : > { %v887_v48 = vadd.f32 %v1905_v54, %v886_v2 }
 0x1fb   : > { %v979_v49 = vadd.f32 %v978_v3, %v887_v48  ;;  %933 = vmatmul.f32.gmra.mxu0 %v808_v32  ;;  %1025 = vmatmul.f32.gmra.mxu1 %v809_v47 }
 0x1fd   : > { %1039 = vst [vmem:[%s1916_s16 + $0x38] sm:$0xff] %v979_v49  ;;  %v667_v11 = vpop.f32.mrf.mxu2  ;;  %v759_v29 = vpop.f32.mrf.mxu3 }
 0x1fe   : > { %v668_v39 = vadd.f32 %v667_v11, %v1812_v42  ;;  %v760_v40 = vadd.f32 %v759_v29, %v1814_v43 }
 0x200   : > { %v810_v57 = vmul.f32 %v668_v39, %v484_v30  ;;  %v811_v62 = vmul.f32 %v760_v40, %v576_v53  ;;  %v889_v1 = vpop.f32.mrf.mxu0  ;;  %v981_v55 = vpop.f32.mrf.mxu1 }
 0x201   : > { %v890_v7 = vadd.f32 %v1905_v54, %v889_v1 }
 0x203   : > { %v982_v8 = vadd.f32 %v981_v55, %v890_v7  ;;  %936 = vmatmul.f32.gmra.mxu0 %v810_v57  ;;  %1028 = vmatmul.f32.gmra.mxu1 %v811_v62 }
 0x205   : > { %1040 = vst [vmem:[%s1916_s16 + $0x40] sm:$0xff] %v982_v8 }
 0x208   : > { %v892_v35 = vpop.f32.mrf.mxu0  ;;  %v984_v38 = vpop.f32.mrf.mxu1 }
 0x209   : > { %v893_v36 = vadd.f32 %v1905_v54, %v892_v35 }
 0x20b   : > { %v985_v41 = vadd.f32 %v984_v38, %v893_v36 }
 0x20d   : > { %1041 = vst [vmem:[%s1916_s16 + $0x48] sm:$0xff] %v985_v41 }
 0x210   : > { %v895_v42 = vpop.f32.mrf.mxu0  ;;  %v987_v43 = vpop.f32.mrf.mxu1 }
 0x211   : > { %v896_v45 = vadd.f32 %v1905_v54, %v895_v42 }
 0x213   : > { %v988_v46 = vadd.f32 %v987_v43, %v896_v45 }
 0x215   : > { %1042 = vst [vmem:[%s1916_s16 + $0x50] sm:$0xff] %v988_v46 }
 0x218   : > { %v898_v56 = vpop.f32.mrf.mxu0  ;;  %v990_v63 = vpop.f32.mrf.mxu1 }
 0x219   : > { %v899_v13 = vadd.f32 %v1905_v54, %v898_v56 }
 0x21b   : > { %v991_v0 = vadd.f32 %v990_v63, %v899_v13 }
 0x21d   : > { %1043 = vst [vmem:[%s1916_s16 + $0x58] sm:$0xff] %v991_v0 }
 0x220   : > { %v901_v4 = vpop.f32.mrf.mxu0  ;;  %v993_v6 = vpop.f32.mrf.mxu1 }
 0x221   : > { %v902_v10 = vadd.f32 %v1905_v54, %v901_v4 }
 0x223   : > { %v994_v12 = vadd.f32 %v993_v6, %v902_v10 }
 0x225   : > { %1044 = vst [vmem:[%s1916_s16 + $0x60] sm:$0xff] %v994_v12 }
 0x228   : > { %v904_v14 = vpop.f32.mrf.mxu0  ;;  %v996_v16 = vpop.f32.mrf.mxu1 }
 0x229   : > { %v905_v51 = vadd.f32 %v1905_v54, %v904_v14 }
 0x22b   : > { %v997_v52 = vadd.f32 %v996_v16, %v905_v51 }
 0x22d   : > { %1045 = vst [vmem:[%s1916_s16 + $0x68] sm:$0xff] %v997_v52 }
 0x230   : > { %v907_v5 = vpop.f32.mrf.mxu0  ;;  %v999_v17 = vpop.f32.mrf.mxu1 }
 0x231   : > { %v908_v18 = vadd.f32 %v1905_v54, %v907_v5 }
 0x233   : > { %v1000_v15 = vadd.f32 %v999_v17, %v908_v18 }
 0x235   : > { %1046 = vst [vmem:[%s1916_s16 + $0x70] sm:$0xff] %v1000_v15 }
 0x238   : > { %v910_v19 = vpop.f32.mrf.mxu0  ;;  %v1002_v58 = vpop.f32.mrf.mxu1 }
 0x239   : > { %v911_v22 = vadd.f32 %v1905_v54, %v910_v19 }
 0x23b   : > { %v1003_v23 = vadd.f32 %v1002_v58, %v911_v22 }
 0x23d   : > { %1047 = vst [vmem:[%s1916_s16 + $0x78] sm:$0xff] %v1003_v23 }
 0x240   : > { %v913_v20 = vpop.f32.mrf.mxu0  ;;  %v1005_v21 = vpop.f32.mrf.mxu1 }
 0x241   : > { %v914_v24 = vadd.f32 %v1905_v54, %v913_v20 }
 0x243   : > { %v1006_v27 = vadd.f32 %v1005_v21, %v914_v24 }
 0x245   : > { %1048 = vst [vmem:[%s1916_s16 + $0x80] sm:$0xff] %v1006_v27 }
 0x248   : > { %v916_v28 = vpop.f32.mrf.mxu0  ;;  %v1008_v59 = vpop.f32.mrf.mxu1 }
 0x249   : > { %v917_v60 = vadd.f32 %v1905_v54, %v916_v28 }
 0x24b   : > { %v1009_v9 = vadd.f32 %v1008_v59, %v917_v60 }
 0x24d   : > { %1049 = vst [vmem:[%s1916_s16 + $0x88] sm:$0xff] %v1009_v9 }
 0x250   : > { %v919_v37 = vpop.f32.mrf.mxu0  ;;  %v1011_v50 = vpop.f32.mrf.mxu1 }
 0x251   : > { %v920_v44 = vadd.f32 %v1905_v54, %v919_v37 }
 0x253   : > { %v1012_v61 = vadd.f32 %v1011_v50, %v920_v44 }
 0x255   : > { %1050 = vst [vmem:[%s1916_s16 + $0x90] sm:$0xff] %v1012_v61 }
 0x258   : > { %v922_v25 = vpop.f32.mrf.mxu0  ;;  %v1014_v26 = vpop.f32.mrf.mxu1 }
 0x259   : > { %v923_v31 = vadd.f32 %v1905_v54, %v922_v25 }
 0x25b   : > { %v1015_v33 = vadd.f32 %v1014_v26, %v923_v31 }
 0x25d   : > { %1051 = vst [vmem:[%s1916_s16 + $0x98] sm:$0xff] %v1015_v33 }
 0x260   : > { %v925_v34 = vpop.f32.mrf.mxu0  ;;  %v1017_v32 = vpop.f32.mrf.mxu1 }
 0x261   : > { %v926_v47 = vadd.f32 %v1905_v54, %v925_v34 }
 0x263   : > { %v1018_v2 = vadd.f32 %v1017_v32, %v926_v47 }
 0x265   : > { %1052 = vst [vmem:[%s1916_s16 + $0xa0] sm:$0xff] %v1018_v2 }
 0x268   : > { %v928_v3 = vpop.f32.mrf.mxu0  ;;  %v1020_v48 = vpop.f32.mrf.mxu1 }
 0x269   : > { %v929_v49 = vadd.f32 %v1905_v54, %v928_v3 }
 0x26b   : > { %v1021_v11 = vadd.f32 %v1020_v48, %v929_v49 }
 0x26d   : > { %1053 = vst [vmem:[%s1916_s16 + $0xa8] sm:$0xff] %v1021_v11 }
 0x270   : > { %v931_v29 = vpop.f32.mrf.mxu0  ;;  %v1023_v30 = vpop.f32.mrf.mxu1 }
 0x271   : > { %v932_v53 = vadd.f32 %v1905_v54, %v931_v29 }
 0x273   : > { %v1024_v39 = vadd.f32 %v1023_v30, %v932_v53 }
 0x275   : > { %1054 = vst [vmem:[%s1916_s16 + $0xb0] sm:$0xff] %v1024_v39 }
 0x278   : > { %v934_v40 = vpop.f32.mrf.mxu0  ;;  %v1026_v57 = vpop.f32.mrf.mxu1 }
 0x279   : > { %v935_v62 = vadd.f32 %v1905_v54, %v934_v40 }
 0x27b   : > { %v1027_v1 = vadd.f32 %v1026_v57, %v935_v62 }
 0x27d   : > { %1055 = vst [vmem:[%s1916_s16 + $0xb8] sm:$0xff] %v1027_v1 }
 0x280   : > { %v937_v55 = vpop.f32.mrf.mxu0  ;;  %v1029_v8 = vpop.f32.mrf.mxu1 }
 0x281   : > { %v938_v7 = vadd.f32 %v1905_v54, %v937_v55 }
 0x283   : > { %v1030_v35 = vadd.f32 %v1029_v8, %v938_v7 }
 0x285   : > { %1056 = vst [vmem:[%s1916_s16 + $0xc0] sm:$0xff] %v1030_v35 }
 0x286   : > { %1456 = shalt.err (!%p1453_p10)
}
 0x287   : > { %s1512_s15 = smov 128   ;;  %s1513_s24 = smov 8  }
 0x288   : > { %1239 = dma.vmem_to_hbm [thread:$0]  (%p1630_p7), %s1071_s8, 3200, %s1073_s11, %s1058_s22, %s1512_s15, %s1512_s15, %s1513_s24  }
 0x289 PF: > { %s1087_s29 = sand.u32 1, %s1491_s18   ;;  %p2067_p12 = scmp.ge.s32.totalorder %s1503_s21, 2 }
 0x28a   : > { %s1088_s16 = scalar_lea.sflag [#allocation4], %s1087_s29 }
 0x28b   : > { %p1256_p13 = pnand %p2067_p12, %p1579_p6 }
 0x28d   : > { %p1257_p0 = pneg %p1256_p13 }
 0x28f   : > { %1486 = dma.done.wait (%p1257_p0), %s1088_s16, 3200  }
 0x290   : > { %1488 = vsyncadd (%p1257_p0), %s1088_s16, 4294964096  ;;  %p20_p3 = scmp.ge.s32.totalorder %s1616_s30, 4   ;;  %s2068_s18 = smov %s1495_s19 }
 0x291   : > { %s2069_s19 = smov %s1499_s20  ;;  %s2070_s20 = smov %s1626_s9 }
 0x292   : > { %s2071_s21 = smov %s1616_s30  ;;  %22 = sbr.rel (!%p20_p3) target bundleno = 9 (0x9), region = 97 }
 0x297   :  { %1094 = vsyncpa [#allocation3], 1 }
 0x298   :  { %1096 = vsyncpa [#allocation3 + $0x1], 1 }
 0x299   :  { %1097 = vsyncpa [#allocation6], 1 }
 0x29a   :  { %1098 = vsyncpa [#allocation9], 1 }
 0x29b   :  { %1099 = vsyncpa [#allocation4], 1 }
 0x29c   :  { %1101 = vsyncpa [#allocation4 + $0x1], 1 }

</bundles_post_ra>
